<compile_context>
chip_gen: v7x
topology: tpu7x:2x2x1
jax: 0.10.0
libtpu: 0.0.40
codegen_flags: <defaults>
</compile_context>

<pallas_src>
import jax
import jax.numpy as jnp
from jax.experimental import pallas as pl
from jax.experimental.pallas import tpu as pltpu


# --------------------------- RESA (+ fused dice) kernel -------------------------

def _make_resa_kernel(height, width, cpad, n_iter, cs, alpha, num_classes=None):
    hw = height * width
    pad = cs // 2

    def roll_lanes(v, shift):
        """jnp.roll(v, shift, axis=1) on a (cpad, hw) value via an XLU rotation."""
        s = shift % hw
        if s == 0:
            return v
        return pltpu.roll(v, s, axis=1)

    def kernel(*refs):
        if num_classes is None:
            x_ref, w_ref, o_ref = refs
        else:
            x_ref, w_ref, gt_ref, o_ref, loss_ref = refs

        # Per-lane (w, h) coordinates from an in-kernel iota (no index DMAs).
        lane = jax.lax.broadcasted_iota(jnp.int32, (cpad, hw), 1)
        if width & (width - 1) == 0:                 # power-of-two fast path
            w_idx = lane & (width - 1)
            h_idx = lane >> (width.bit_length() - 1)
        else:
            w_idx = lane % width
            h_idx = lane // width
        zero = jnp.zeros((cpad, hw), jnp.float32)

        # Hoisted boolean masks (full (cpad, hw) so no per-use re-broadcast).
        w_tap_mask, h_tap_mask = {}, {}
        for k in range(cs):
            d = k - pad
            if d == 0:
                continue
            w_tap_mask[d] = (w_idx >= -d) & (w_idx < width - d)
            h_tap_mask[d] = (h_idx >= -d) & (h_idx < height - d)

        w_gather_mask = {}
        for sign in (1, -1):
            for it in range(n_iter):
                t = (sign * (width // 2 ** (n_iter - it))) % width
                if t != 0 and t not in w_gather_mask:
                    w_gather_mask[t] = w_idx < (width - t)

        # Running RESA state lives in SSA values; written to o_ref once at the end.
        x = x_ref[0].astype(jnp.float32)

        # PyTorch order: ['d', 'u'] (1xcs conv along W, cyclic gather over H),
        # then ['r', 'l'] (csx1 conv along H, cyclic gather over W), each
        # direction running all n_iter iterations on the in-place state.
        stage = 0
        for vertical, sign in ((True, 1), (True, -1), (False, 1), (False, -1)):
            for it in range(n_iter):
                conv = None
                for k in range(cs):
                    d = k - pad
                    if d == 0:
                        tap = x
                    elif vertical:    # out[., h, w] += W_k @ x[., h, w + d]
                        tap = jnp.where(w_tap_mask[d], roll_lanes(x, -d), zero)
                    else:             # out[., h, w] += W_k @ x[., h + d, w]
                        tap = jnp.where(h_tap_mask[d], roll_lanes(x, -d * width), zero)
                    y = jnp.dot(w_ref[stage * cs + k], tap.astype(jnp.bfloat16),
                                preferred_element_type=jnp.float32)
                    conv = y if conv is None else conv + y

                z = alpha * jnp.maximum(conv, 0.0)

                # Cyclic RESA gather: the row/col permutation commutes with the
                # conv + relu, so a single roll of the finished update suffices.
                if vertical:
                    s = sign * (height // 2 ** (n_iter - it))
                    g = roll_lanes(z, -s * width)          # exact cyclic roll over H
                else:
                    t = (sign * (width // 2 ** (n_iter - it))) % width
                    if t == 0:
                        g = z
                    else:
                        g = jnp.where(w_gather_mask[t],
                                      roll_lanes(z, -t),           # w <  W - t
                                      roll_lanes(z, width - t))    # w >= W - t
                x = x + g
                stage += 1

        o_ref[0] = x

        # Fused dice-loss epilogue (softmax over real classes, drop background).
        if num_classes is not None:
            kc = num_classes
            gt = gt_ref[0]                                          # (1, hw) int32
            cls = jax.lax.broadcasted_iota(jnp.int32, (cpad, hw), 0)
            valid = cls < kc
            m = jnp.max(jnp.where(valid, x, -jnp.inf), axis=0, keepdims=True)
            e = jnp.where(valid, jnp.exp(x - m), zero)
            p = e * pl.reciprocal(jnp.sum(e, axis=0, keepdims=True), approx=True)
            fg = ((cls >= 1) & valid).astype(jnp.float32)           # classes 1..K-1
            tgt = (cls == gt).astype(jnp.float32) * fg              # one-hot target
            pi = p * fg

            def red(v):                                             # -> (1, 1)
                return jnp.sum(jnp.sum(v, axis=1, keepdims=True),
                               axis=0, keepdims=True)

            a = red(pi * tgt)
            b = red(pi * pi) + 0.001
            c = red(tgt * tgt) + 0.001
            loss_ref[0] = 1.0 - 2.0 * a / (b + c)                   # per-batch dice

    return kernel


def resa_forward(x_pad, w_taps, gt_flat, *, height, width, n_iter, cs, alpha,
                 num_classes, c_real):
    n, cpad, hw = x_pad.shape
    n_taps = w_taps.shape[0]
    with_loss = gt_flat is not None
    kernel = _make_resa_kernel(height, width, cpad, n_iter, cs, alpha,
                               num_classes if with_loss else None)

    # Real (unpadded) work: 4*n_iter stages x cs taps of (C x C) @ (C x hw).
    flops = 2 * n * (4 * n_iter) * cs * c_real * c_real * hw
    transcendentals = n * num_classes * hw if with_loss else 0
    bytes_accessed = (2 * n * c_real * hw * 4 + w_taps.size * 2
                      + (n * hw * 4 + n * 4 if with_loss else 0))

    in_specs = [
        pl.BlockSpec((1, cpad, hw), lambda b: (b, 0, 0)),
        # Static weights: constant index_map, so the same (tiny) block is reused
        # every grid step.  (At production sizes on v7x this spec could also be
        # single-buffered via pipeline_mode=pl.Buffered(1).)
        pl.BlockSpec((n_taps, cpad, cpad), lambda b: (0, 0, 0)),
    ]
    if with_loss:
        in_specs.append(pl.BlockSpec((1, 1, hw), lambda b: (b, 0, 0)))
        out_shape = (jax.ShapeDtypeStruct((n, cpad, hw), jnp.float32),
                     jax.ShapeDtypeStruct((n, 1, 1), jnp.float32))
        out_specs = (pl.BlockSpec((1, cpad, hw), lambda b: (b, 0, 0)),
                     pl.BlockSpec((1, 1, 1), lambda b: (b, 0, 0)))
        args = (x_pad, w_taps, gt_flat)
    else:
        out_shape = jax.ShapeDtypeStruct((n, cpad, hw), jnp.float32)
        out_specs = pl.BlockSpec((1, cpad, hw), lambda b: (b, 0, 0))
        args = (x_pad, w_taps)

    outs = pl.pallas_call(
        kernel,
        out_shape=out_shape,
        grid=(n,),
        in_specs=in_specs,
        out_specs=out_specs,
        compiler_params=pltpu.CompilerParams(
            dimension_semantics=("parallel",),
            vmem_limit_bytes=16 * 1024 * 1024),
        cost_estimate=pl.CostEstimate(flops=flops,
                                      transcendentals=transcendentals,
                                      bytes_accessed=bytes_accessed),
    )(*args)

    if with_loss:
        out_pad, per_batch = outs
        return out_pad, per_batch
    return outs, None


# --------------------------------- RESANet glue --------------------------------

def init_resa_params(key, c, n_iter, cs):
    """Conv2d(chan, chan, 1xk / kx1, bias=False) weights for all 4 directions,
    stored per (direction, iter, tap) as a zero-padded (Cpad, Cpad) bf16 block."""
    cpad = ((c + 7) // 8) * 8
    keys = jax.random.split(key, 4)
    bound = 1.0 / (c * cs) ** 0.5
    taps = []
    for d, kk in zip("durl", keys):
        # torch layout (n_iter, Cout, Cin, cs)
        w = jax.random.uniform(kk, (n_iter, c, c, cs), jnp.float32, -bound, bound)
        for it in range(n_iter):
            for k in range(cs):
                blk = jnp.zeros((cpad, cpad), jnp.float32)
                blk = blk.at[:c, :c].set(w[it, :, :, k])         # [co, ci]
                taps.append(blk)
    w_taps = jnp.stack(taps, axis=0).astype(jnp.bfloat16)        # (4*n_iter*cs, Cpad, Cpad)
    return {"w_taps": w_taps, "cpad": cpad}


def resanet_forward(img_nchw, seg_gt, w_taps, cfg):
    n, c, height, width = img_nchw.shape
    hw = height * width
    cpad = w_taps.shape[-1]

    # TODO(synk): ResNetWrapper backbone is not defined in the provided source
    #             -> the input is used directly as the backbone feature map.
    fea = img_nchw.astype(jnp.float32).reshape(n, c, hw)
    fea = jnp.pad(fea, ((0, 0), (0, cpad - c), (0, 0)))          # channel pad to 8

    gt_flat = None
    if seg_gt is not None:
        gt_flat = seg_gt.astype(jnp.int32).reshape(n, 1, hw)

    out_pad, per_batch = resa_forward(
        fea, w_taps, gt_flat, height=height, width=width,
        n_iter=cfg["iter"], cs=cfg["conv_stride"], alpha=cfg["alpha"],
        num_classes=cfg["num_classes"], c_real=c)

    # TODO(synk): decoder (eval(cfg.decoder)) is not defined in the provided
    #             source -> the RESA output is used directly as seg_pred.
    seg_pred = out_pad[:, :c, :].reshape(n, c, height, width)

    if seg_gt is not None:
        loss = jnp.mean(per_batch)
    else:
        loss = jnp.zeros((), img_nchw.dtype)
    return seg_pred, loss


# ------------------------------------ main -------------------------------------

if __name__ == "__main__":
    # Forward-consistent small config: num_classes = 5 (the reference CE weight
    # has 5 entries), resa.input_channel = 5, 16x16 feature map, iter = 2,
    # conv_stride = 5, alpha = 2.0.
    cfg = {"iter": 2, "conv_stride": 5, "alpha": 2.0, "num_classes": 5}
    N, C, H, W = 2, 5, 16, 16

    key = jax.random.PRNGKey(0)
    k_img, k_gt, k_par = jax.random.split(key, 3)

    img = jax.random.normal(k_img, (N, C, H, W), jnp.float32)        # NCHW feature
    seg_gt = jax.random.randint(k_gt, (N, H, W), 0, cfg["num_classes"])
    params = init_resa_params(k_par, C, cfg["iter"], cfg["conv_stride"])

    fwd = jax.jit(lambda im, gt, w: resanet_forward(im, gt, w, cfg))
    seg_pred, loss = fwd(img, seg_gt, params["w_taps"])
    jax.block_until_ready((seg_pred, loss))

    assert seg_pred.shape == (N, C, H, W)
    assert bool(jnp.isfinite(loss)) and bool(jnp.all(jnp.isfinite(seg_pred)))
    print("KERNEL_OK")
</pallas_src>

<mosaic_0001>
module attributes {stable_mosaic.version = 11 : i64} {
  func.func @kernel(%arg0: i32, %arg1: memref<1x8x256xf32, #tpu.memory_space<vmem>>, %arg2: memref<40x8x8xbf16, #tpu.memory_space<vmem>>, %arg3: memref<1x1x256xi32, #tpu.memory_space<vmem>>, %arg4: memref<1x8x256xf32, #tpu.memory_space<vmem>>, %arg5: memref<1x1x1xf32, #tpu.memory_space<vmem>>) attributes {dimension_semantics = [#tpu.dimension_semantics<parallel>], iteration_bounds = array<i64: 2>, scalar_prefetch = 0 : i64, scratch_operands = 0 : i64, tpu.core_type = #tpu.core_type<tc>, window_params = [{transform_indices = @transform_0, window_bounds = array<i64: 1, 8, 256>}, {pipeline_mode = #tpu.pipeline_mode<synchronous>, transform_indices = @transform_1, window_bounds = array<i64: 40, 8, 8>}, {transform_indices = @transform_2, window_bounds = array<i64: 1, 1, 256>}, {transform_indices = @transform_3, window_bounds = array<i64: 1, 8, 256>}, {transform_indices = @transform_4, window_bounds = array<i64: 1, 1, 1>}]} {
    %0 = tpu.iota {dimensions = array<i32: 1>} : vector<8x256xi32>
    %c15_i32 = arith.constant 15 : i32
    %1 = vector.broadcast %c15_i32 : i32 to vector<8x256xi32>
    %2 = arith.andi %0, %1 : vector<8x256xi32>
    %c4_i32 = arith.constant 4 : i32
    %3 = vector.broadcast %c4_i32 : i32 to vector<8x256xi32>
    %4 = arith.shrsi %0, %3 : vector<8x256xi32>
    %cst = arith.constant 0.000000e+00 : f32
    %5 = vector.broadcast %cst : f32 to vector<8x256xf32>
    %c2_i32 = arith.constant 2 : i32
    %6 = vector.broadcast %c2_i32 : i32 to vector<8x256xi32>
    %7 = arith.cmpi sge, %2, %6 : vector<8x256xi32>
    %c18_i32 = arith.constant 18 : i32
    %8 = vector.broadcast %c18_i32 : i32 to vector<8x256xi32>
    %9 = arith.cmpi slt, %2, %8 : vector<8x256xi32>
    %10 = arith.andi %7, %9 : vector<8x256xi1>
    %c2_i32_0 = arith.constant 2 : i32
    %11 = vector.broadcast %c2_i32_0 : i32 to vector<8x256xi32>
    %12 = arith.cmpi sge, %4, %11 : vector<8x256xi32>
    %c18_i32_1 = arith.constant 18 : i32
    %13 = vector.broadcast %c18_i32_1 : i32 to vector<8x256xi32>
    %14 = arith.cmpi slt, %4, %13 : vector<8x256xi32>
    %15 = arith.andi %12, %14 : vector<8x256xi1>
    %c1_i32 = arith.constant 1 : i32
    %16 = vector.broadcast %c1_i32 : i32 to vector<8x256xi32>
    %17 = arith.cmpi sge, %2, %16 : vector<8x256xi32>
    %c17_i32 = arith.constant 17 : i32
    %18 = vector.broadcast %c17_i32 : i32 to vector<8x256xi32>
    %19 = arith.cmpi slt, %2, %18 : vector<8x256xi32>
    %20 = arith.andi %17, %19 : vector<8x256xi1>
    %c1_i32_2 = arith.constant 1 : i32
    %21 = vector.broadcast %c1_i32_2 : i32 to vector<8x256xi32>
    %22 = arith.cmpi sge, %4, %21 : vector<8x256xi32>
    %c17_i32_3 = arith.constant 17 : i32
    %23 = vector.broadcast %c17_i32_3 : i32 to vector<8x256xi32>
    %24 = arith.cmpi slt, %4, %23 : vector<8x256xi32>
    %25 = arith.andi %22, %24 : vector<8x256xi1>
    %c-1_i32 = arith.constant -1 : i32
    %26 = vector.broadcast %c-1_i32 : i32 to vector<8x256xi32>
    %27 = arith.cmpi sge, %2, %26 : vector<8x256xi32>
    %c15_i32_4 = arith.constant 15 : i32
    %28 = vector.broadcast %c15_i32_4 : i32 to vector<8x256xi32>
    %29 = arith.cmpi slt, %2, %28 : vector<8x256xi32>
    %30 = arith.andi %27, %29 : vector<8x256xi1>
    %c-1_i32_5 = arith.constant -1 : i32
    %31 = vector.broadcast %c-1_i32_5 : i32 to vector<8x256xi32>
    %32 = arith.cmpi sge, %4, %31 : vector<8x256xi32>
    %c15_i32_6 = arith.constant 15 : i32
    %33 = vector.broadcast %c15_i32_6 : i32 to vector<8x256xi32>
    %34 = arith.cmpi slt, %4, %33 : vector<8x256xi32>
    %35 = arith.andi %32, %34 : vector<8x256xi1>
    %c-2_i32 = arith.constant -2 : i32
    %36 = vector.broadcast %c-2_i32 : i32 to vector<8x256xi32>
    %37 = arith.cmpi sge, %2, %36 : vector<8x256xi32>
    %c14_i32 = arith.constant 14 : i32
    %38 = vector.broadcast %c14_i32 : i32 to vector<8x256xi32>
    %39 = arith.cmpi slt, %2, %38 : vector<8x256xi32>
    %40 = arith.andi %37, %39 : vector<8x256xi1>
    %c-2_i32_7 = arith.constant -2 : i32
    %41 = vector.broadcast %c-2_i32_7 : i32 to vector<8x256xi32>
    %42 = arith.cmpi sge, %4, %41 : vector<8x256xi32>
    %c14_i32_8 = arith.constant 14 : i32
    %43 = vector.broadcast %c14_i32_8 : i32 to vector<8x256xi32>
    %44 = arith.cmpi slt, %4, %43 : vector<8x256xi32>
    %45 = arith.andi %42, %44 : vector<8x256xi1>
    %c12_i32 = arith.constant 12 : i32
    %46 = vector.broadcast %c12_i32 : i32 to vector<8x256xi32>
    %47 = arith.cmpi slt, %2, %46 : vector<8x256xi32>
    %c8_i32 = arith.constant 8 : i32
    %48 = vector.broadcast %c8_i32 : i32 to vector<8x256xi32>
    %49 = arith.cmpi slt, %2, %48 : vector<8x256xi32>
    %c4_i32_9 = arith.constant 4 : i32
    %50 = vector.broadcast %c4_i32_9 : i32 to vector<8x256xi32>
    %51 = arith.cmpi slt, %2, %50 : vector<8x256xi32>
    %c0 = arith.constant 0 : index
    %c0_10 = arith.constant 0 : index
    %c0_11 = arith.constant 0 : index
    %52 = vector.load %arg1[%c0, %c0_10, %c0_11] : memref<1x8x256xf32, #tpu.memory_space<vmem>>, vector<1x8x256xf32>
    %53 = vector.shape_cast %52 : vector<1x8x256xf32> to vector<8x256xf32>
    %c2_i32_12 = arith.constant 2 : i32
    %54 = tpu.dynamic_rotate %53 by %c2_i32_12 dim 1 : vector<8x256xf32>, i32 -> vector<8x256xf32>
    %55 = arith.select %10, %54, %5 : vector<8x256xi1>, vector<8x256xf32>
    %c0_13 = arith.constant 0 : index
    %c0_14 = arith.constant 0 : index
    %c0_15 = arith.constant 0 : index
    %56 = vector.load %arg2[%c0_13, %c0_14, %c0_15] : memref<40x8x8xbf16, #tpu.memory_space<vmem>>, vector<1x8x8xbf16>
    %57 = vector.shape_cast %56 : vector<1x8x8xbf16> to vector<8x8xbf16>
    %58 = arith.truncf %55 : vector<8x256xf32> to vector<8x256xbf16>
    %cst_16 = arith.constant dense<0.000000e+00> : vector<8x256xf32>
    %59 = tpu.matmul %57, %58, %cst_16 {dimension_numbers = #tpu.dot_dimension_numbers<[1], [0], [0], [1], [0, 0, 1, 1], [], []>} : vector<8x8xbf16>, vector<8x256xbf16>, vector<8x256xf32> -> vector<8x256xf32>
    %c1_i32_17 = arith.constant 1 : i32
    %60 = tpu.dynamic_rotate %53 by %c1_i32_17 dim 1 : vector<8x256xf32>, i32 -> vector<8x256xf32>
    %61 = arith.select %20, %60, %5 : vector<8x256xi1>, vector<8x256xf32>
    %c1 = arith.constant 1 : index
    %c0_18 = arith.constant 0 : index
    %c0_19 = arith.constant 0 : index
    %62 = vector.load %arg2[%c1, %c0_18, %c0_19] : memref<40x8x8xbf16, #tpu.memory_space<vmem>>, vector<1x8x8xbf16>
    %63 = vector.shape_cast %62 : vector<1x8x8xbf16> to vector<8x8xbf16>
    %64 = arith.truncf %61 : vector<8x256xf32> to vector<8x256xbf16>
    %cst_20 = arith.constant dense<0.000000e+00> : vector<8x256xf32>
    %65 = tpu.matmul %63, %64, %cst_20 {dimension_numbers = #tpu.dot_dimension_numbers<[1], [0], [0], [1], [0, 0, 1, 1], [], []>} : vector<8x8xbf16>, vector<8x256xbf16>, vector<8x256xf32> -> vector<8x256xf32>
    %66 = arith.addf %59, %65 : vector<8x256xf32>
    %c2 = arith.constant 2 : index
    %c0_21 = arith.constant 0 : index
    %c0_22 = arith.constant 0 : index
    %67 = vector.load %arg2[%c2, %c0_21, %c0_22] : memref<40x8x8xbf16, #tpu.memory_space<vmem>>, vector<1x8x8xbf16>
    %68 = vector.shape_cast %67 : vector<1x8x8xbf16> to vector<8x8xbf16>
    %69 = arith.truncf %53 : vector<8x256xf32> to vector<8x256xbf16>
    %cst_23 = arith.constant dense<0.000000e+00> : vector<8x256xf32>
    %70 = tpu.matmul %68, %69, %cst_23 {dimension_numbers = #tpu.dot_dimension_numbers<[1], [0], [0], [1], [0, 0, 1, 1], [], []>} : vector<8x8xbf16>, vector<8x256xbf16>, vector<8x256xf32> -> vector<8x256xf32>
    %71 = arith.addf %66, %70 : vector<8x256xf32>
    %c255_i32 = arith.constant 255 : i32
    %72 = tpu.dynamic_rotate %53 by %c255_i32 dim 1 : vector<8x256xf32>, i32 -> vector<8x256xf32>
    %73 = arith.select %30, %72, %5 : vector<8x256xi1>, vector<8x256xf32>
    %c3 = arith.constant 3 : index
    %c0_24 = arith.constant 0 : index
    %c0_25 = arith.constant 0 : index
    %74 = vector.load %arg2[%c3, %c0_24, %c0_25] : memref<40x8x8xbf16, #tpu.memory_space<vmem>>, vector<1x8x8xbf16>
    %75 = vector.shape_cast %74 : vector<1x8x8xbf16> to vector<8x8xbf16>
    %76 = arith.truncf %73 : vector<8x256xf32> to vector<8x256xbf16>
    %cst_26 = arith.constant dense<0.000000e+00> : vector<8x256xf32>
    %77 = tpu.matmul %75, %76, %cst_26 {dimension_numbers = #tpu.dot_dimension_numbers<[1], [0], [0], [1], [0, 0, 1, 1], [], []>} : vector<8x8xbf16>, vector<8x256xbf16>, vector<8x256xf32> -> vector<8x256xf32>
    %78 = arith.addf %71, %77 : vector<8x256xf32>
    %c254_i32 = arith.constant 254 : i32
    %79 = tpu.dynamic_rotate %53 by %c254_i32 dim 1 : vector<8x256xf32>, i32 -> vector<8x256xf32>
    %80 = arith.select %40, %79, %5 : vector<8x256xi1>, vector<8x256xf32>
    %c4 = arith.constant 4 : index
    %c0_27 = arith.constant 0 : index
    %c0_28 = arith.constant 0 : index
    %81 = vector.load %arg2[%c4, %c0_27, %c0_28] : memref<40x8x8xbf16, #tpu.memory_space<vmem>>, vector<1x8x8xbf16>
    %82 = vector.shape_cast %81 : vector<1x8x8xbf16> to vector<8x8xbf16>
    %83 = arith.truncf %80 : vector<8x256xf32> to vector<8x256xbf16>
    %cst_29 = arith.constant dense<0.000000e+00> : vector<8x256xf32>
    %84 = tpu.matmul %82, %83, %cst_29 {dimension_numbers = #tpu.dot_dimension_numbers<[1], [0], [0], [1], [0, 0, 1, 1], [], []>} : vector<8x8xbf16>, vector<8x256xbf16>, vector<8x256xf32> -> vector<8x256xf32>
    %85 = arith.addf %78, %84 : vector<8x256xf32>
    %cst_30 = arith.constant 0.000000e+00 : f32
    %86 = vector.broadcast %cst_30 : f32 to vector<8x256xf32>
    %87 = arith.maximumf %85, %86 : vector<8x256xf32>
    %cst_31 = arith.constant 2.000000e+00 : f32
    %88 = vector.broadcast %cst_31 : f32 to vector<8x256xf32>
    %89 = arith.mulf %88, %87 : vector<8x256xf32>
    %c192_i32 = arith.constant 192 : i32
    %90 = tpu.dynamic_rotate %89 by %c192_i32 dim 1 : vector<8x256xf32>, i32 -> vector<8x256xf32>
    %91 = arith.addf %53, %90 : vector<8x256xf32>
    %c2_i32_32 = arith.constant 2 : i32
    %92 = tpu.dynamic_rotate %91 by %c2_i32_32 dim 1 : vector<8x256xf32>, i32 -> vector<8x256xf32>
    %93 = arith.select %10, %92, %5 : vector<8x256xi1>, vector<8x256xf32>
    %c5 = arith.constant 5 : index
    %c0_33 = arith.constant 0 : index
    %c0_34 = arith.constant 0 : index
    %94 = vector.load %arg2[%c5, %c0_33, %c0_34] : memref<40x8x8xbf16, #tpu.memory_space<vmem>>, vector<1x8x8xbf16>
    %95 = vector.shape_cast %94 : vector<1x8x8xbf16> to vector<8x8xbf16>
    %96 = arith.truncf %93 : vector<8x256xf32> to vector<8x256xbf16>
    %cst_35 = arith.constant dense<0.000000e+00> : vector<8x256xf32>
    %97 = tpu.matmul %95, %96, %cst_35 {dimension_numbers = #tpu.dot_dimension_numbers<[1], [0], [0], [1], [0, 0, 1, 1], [], []>} : vector<8x8xbf16>, vector<8x256xbf16>, vector<8x256xf32> -> vector<8x256xf32>
    %c1_i32_36 = arith.constant 1 : i32
    %98 = tpu.dynamic_rotate %91 by %c1_i32_36 dim 1 : vector<8x256xf32>, i32 -> vector<8x256xf32>
    %99 = arith.select %20, %98, %5 : vector<8x256xi1>, vector<8x256xf32>
    %c6 = arith.constant 6 : index
    %c0_37 = arith.constant 0 : index
    %c0_38 = arith.constant 0 : index
    %100 = vector.load %arg2[%c6, %c0_37, %c0_38] : memref<40x8x8xbf16, #tpu.memory_space<vmem>>, vector<1x8x8xbf16>
    %101 = vector.shape_cast %100 : vector<1x8x8xbf16> to vector<8x8xbf16>
    %102 = arith.truncf %99 : vector<8x256xf32> to vector<8x256xbf16>
    %cst_39 = arith.constant dense<0.000000e+00> : vector<8x256xf32>
    %103 = tpu.matmul %101, %102, %cst_39 {dimension_numbers = #tpu.dot_dimension_numbers<[1], [0], [0], [1], [0, 0, 1, 1], [], []>} : vector<8x8xbf16>, vector<8x256xbf16>, vector<8x256xf32> -> vector<8x256xf32>
    %104 = arith.addf %97, %103 : vector<8x256xf32>
    %c7 = arith.constant 7 : index
    %c0_40 = arith.constant 0 : index
    %c0_41 = arith.constant 0 : index
    %105 = vector.load %arg2[%c7, %c0_40, %c0_41] : memref<40x8x8xbf16, #tpu.memory_space<vmem>>, vector<1x8x8xbf16>
    %106 = vector.shape_cast %105 : vector<1x8x8xbf16> to vector<8x8xbf16>
    %107 = arith.truncf %91 : vector<8x256xf32> to vector<8x256xbf16>
    %cst_42 = arith.constant dense<0.000000e+00> : vector<8x256xf32>
    %108 = tpu.matmul %106, %107, %cst_42 {dimension_numbers = #tpu.dot_dimension_numbers<[1], [0], [0], [1], [0, 0, 1, 1], [], []>} : vector<8x8xbf16>, vector<8x256xbf16>, vector<8x256xf32> -> vector<8x256xf32>
    %109 = arith.addf %104, %108 : vector<8x256xf32>
    %c255_i32_43 = arith.constant 255 : i32
    %110 = tpu.dynamic_rotate %91 by %c255_i32_43 dim 1 : vector<8x256xf32>, i32 -> vector<8x256xf32>
    %111 = arith.select %30, %110, %5 : vector<8x256xi1>, vector<8x256xf32>
    %c8 = arith.constant 8 : index
    %c0_44 = arith.constant 0 : index
    %c0_45 = arith.constant 0 : index
    %112 = vector.load %arg2[%c8, %c0_44, %c0_45] : memref<40x8x8xbf16, #tpu.memory_space<vmem>>, vector<1x8x8xbf16>
    %113 = vector.shape_cast %112 : vector<1x8x8xbf16> to vector<8x8xbf16>
    %114 = arith.truncf %111 : vector<8x256xf32> to vector<8x256xbf16>
    %cst_46 = arith.constant dense<0.000000e+00> : vector<8x256xf32>
    %115 = tpu.matmul %113, %114, %cst_46 {dimension_numbers = #tpu.dot_dimension_numbers<[1], [0], [0], [1], [0, 0, 1, 1], [], []>} : vector<8x8xbf16>, vector<8x256xbf16>, vector<8x256xf32> -> vector<8x256xf32>
    %116 = arith.addf %109, %115 : vector<8x256xf32>
    %c254_i32_47 = arith.constant 254 : i32
    %117 = tpu.dynamic_rotate %91 by %c254_i32_47 dim 1 : vector<8x256xf32>, i32 -> vector<8x256xf32>
    %118 = arith.select %40, %117, %5 : vector<8x256xi1>, vector<8x256xf32>
    %c9 = arith.constant 9 : index
    %c0_48 = arith.constant 0 : index
    %c0_49 = arith.constant 0 : index
    %119 = vector.load %arg2[%c9, %c0_48, %c0_49] : memref<40x8x8xbf16, #tpu.memory_space<vmem>>, vector<1x8x8xbf16>
    %120 = vector.shape_cast %119 : vector<1x8x8xbf16> to vector<8x8xbf16>
    %121 = arith.truncf %118 : vector<8x256xf32> to vector<8x256xbf16>
    %cst_50 = arith.constant dense<0.000000e+00> : vector<8x256xf32>
    %122 = tpu.matmul %120, %121, %cst_50 {dimension_numbers = #tpu.dot_dimension_numbers<[1], [0], [0], [1], [0, 0, 1, 1], [], []>} : vector<8x8xbf16>, vector<8x256xbf16>, vector<8x256xf32> -> vector<8x256xf32>
    %123 = arith.addf %116, %122 : vector<8x256xf32>
    %cst_51 = arith.constant 0.000000e+00 : f32
    %124 = vector.broadcast %cst_51 : f32 to vector<8x256xf32>
    %125 = arith.maximumf %123, %124 : vector<8x256xf32>
    %cst_52 = arith.constant 2.000000e+00 : f32
    %126 = vector.broadcast %cst_52 : f32 to vector<8x256xf32>
    %127 = arith.mulf %126, %125 : vector<8x256xf32>
    %c128_i32 = arith.constant 128 : i32
    %128 = tpu.dynamic_rotate %127 by %c128_i32 dim 1 : vector<8x256xf32>, i32 -> vector<8x256xf32>
    %129 = arith.addf %91, %128 : vector<8x256xf32>
    %c2_i32_53 = arith.constant 2 : i32
    %130 = tpu.dynamic_rotate %129 by %c2_i32_53 dim 1 : vector<8x256xf32>, i32 -> vector<8x256xf32>
    %131 = arith.select %10, %130, %5 : vector<8x256xi1>, vector<8x256xf32>
    %c10 = arith.constant 10 : index
    %c0_54 = arith.constant 0 : index
    %c0_55 = arith.constant 0 : index
    %132 = vector.load %arg2[%c10, %c0_54, %c0_55] : memref<40x8x8xbf16, #tpu.memory_space<vmem>>, vector<1x8x8xbf16>
    %133 = vector.shape_cast %132 : vector<1x8x8xbf16> to vector<8x8xbf16>
    %134 = arith.truncf %131 : vector<8x256xf32> to vector<8x256xbf16>
    %cst_56 = arith.constant dense<0.000000e+00> : vector<8x256xf32>
    %135 = tpu.matmul %133, %134, %cst_56 {dimension_numbers = #tpu.dot_dimension_numbers<[1], [0], [0], [1], [0, 0, 1, 1], [], []>} : vector<8x8xbf16>, vector<8x256xbf16>, vector<8x256xf32> -> vector<8x256xf32>
    %c1_i32_57 = arith.constant 1 : i32
    %136 = tpu.dynamic_rotate %129 by %c1_i32_57 dim 1 : vector<8x256xf32>, i32 -> vector<8x256xf32>
    %137 = arith.select %20, %136, %5 : vector<8x256xi1>, vector<8x256xf32>
    %c11 = arith.constant 11 : index
    %c0_58 = arith.constant 0 : index
    %c0_59 = arith.constant 0 : index
    %138 = vector.load %arg2[%c11, %c0_58, %c0_59] : memref<40x8x8xbf16, #tpu.memory_space<vmem>>, vector<1x8x8xbf16>
    %139 = vector.shape_cast %138 : vector<1x8x8xbf16> to vector<8x8xbf16>
    %140 = arith.truncf %137 : vector<8x256xf32> to vector<8x256xbf16>
    %cst_60 = arith.constant dense<0.000000e+00> : vector<8x256xf32>
    %141 = tpu.matmul %139, %140, %cst_60 {dimension_numbers = #tpu.dot_dimension_numbers<[1], [0], [0], [1], [0, 0, 1, 1], [], []>} : vector<8x8xbf16>, vector<8x256xbf16>, vector<8x256xf32> -> vector<8x256xf32>
    %142 = arith.addf %135, %141 : vector<8x256xf32>
    %c12 = arith.constant 12 : index
    %c0_61 = arith.constant 0 : index
    %c0_62 = arith.constant 0 : index
    %143 = vector.load %arg2[%c12, %c0_61, %c0_62] : memref<40x8x8xbf16, #tpu.memory_space<vmem>>, vector<1x8x8xbf16>
    %144 = vector.shape_cast %143 : vector<1x8x8xbf16> to vector<8x8xbf16>
    %145 = arith.truncf %129 : vector<8x256xf32> to vector<8x256xbf16>
    %cst_63 = arith.constant dense<0.000000e+00> : vector<8x256xf32>
    %146 = tpu.matmul %144, %145, %cst_63 {dimension_numbers = #tpu.dot_dimension_numbers<[1], [0], [0], [1], [0, 0, 1, 1], [], []>} : vector<8x8xbf16>, vector<8x256xbf16>, vector<8x256xf32> -> vector<8x256xf32>
    %147 = arith.addf %142, %146 : vector<8x256xf32>
    %c255_i32_64 = arith.constant 255 : i32
    %148 = tpu.dynamic_rotate %129 by %c255_i32_64 dim 1 : vector<8x256xf32>, i32 -> vector<8x256xf32>
    %149 = arith.select %30, %148, %5 : vector<8x256xi1>, vector<8x256xf32>
    %c13 = arith.constant 13 : index
    %c0_65 = arith.constant 0 : index
    %c0_66 = arith.constant 0 : index
    %150 = vector.load %arg2[%c13, %c0_65, %c0_66] : memref<40x8x8xbf16, #tpu.memory_space<vmem>>, vector<1x8x8xbf16>
    %151 = vector.shape_cast %150 : vector<1x8x8xbf16> to vector<8x8xbf16>
    %152 = arith.truncf %149 : vector<8x256xf32> to vector<8x256xbf16>
    %cst_67 = arith.constant dense<0.000000e+00> : vector<8x256xf32>
    %153 = tpu.matmul %151, %152, %cst_67 {dimension_numbers = #tpu.dot_dimension_numbers<[1], [0], [0], [1], [0, 0, 1, 1], [], []>} : vector<8x8xbf16>, vector<8x256xbf16>, vector<8x256xf32> -> vector<8x256xf32>
    %154 = arith.addf %147, %153 : vector<8x256xf32>
    %c254_i32_68 = arith.constant 254 : i32
    %155 = tpu.dynamic_rotate %129 by %c254_i32_68 dim 1 : vector<8x256xf32>, i32 -> vector<8x256xf32>
    %156 = arith.select %40, %155, %5 : vector<8x256xi1>, vector<8x256xf32>
    %c14 = arith.constant 14 : index
    %c0_69 = arith.constant 0 : index
    %c0_70 = arith.constant 0 : index
    %157 = vector.load %arg2[%c14, %c0_69, %c0_70] : memref<40x8x8xbf16, #tpu.memory_space<vmem>>, vector<1x8x8xbf16>
    %158 = vector.shape_cast %157 : vector<1x8x8xbf16> to vector<8x8xbf16>
    %159 = arith.truncf %156 : vector<8x256xf32> to vector<8x256xbf16>
    %cst_71 = arith.constant dense<0.000000e+00> : vector<8x256xf32>
    %160 = tpu.matmul %158, %159, %cst_71 {dimension_numbers = #tpu.dot_dimension_numbers<[1], [0], [0], [1], [0, 0, 1, 1], [], []>} : vector<8x8xbf16>, vector<8x256xbf16>, vector<8x256xf32> -> vector<8x256xf32>
    %161 = arith.addf %154, %160 : vector<8x256xf32>
    %cst_72 = arith.constant 0.000000e+00 : f32
    %162 = vector.broadcast %cst_72 : f32 to vector<8x256xf32>
    %163 = arith.maximumf %161, %162 : vector<8x256xf32>
    %cst_73 = arith.constant 2.000000e+00 : f32
    %164 = vector.broadcast %cst_73 : f32 to vector<8x256xf32>
    %165 = arith.mulf %164, %163 : vector<8x256xf32>
    %c64_i32 = arith.constant 64 : i32
    %166 = tpu.dynamic_rotate %165 by %c64_i32 dim 1 : vector<8x256xf32>, i32 -> vector<8x256xf32>
    %167 = arith.addf %129, %166 : vector<8x256xf32>
    %c2_i32_74 = arith.constant 2 : i32
    %168 = tpu.dynamic_rotate %167 by %c2_i32_74 dim 1 : vector<8x256xf32>, i32 -> vector<8x256xf32>
    %169 = arith.select %10, %168, %5 : vector<8x256xi1>, vector<8x256xf32>
    %c15 = arith.constant 15 : index
    %c0_75 = arith.constant 0 : index
    %c0_76 = arith.constant 0 : index
    %170 = vector.load %arg2[%c15, %c0_75, %c0_76] : memref<40x8x8xbf16, #tpu.memory_space<vmem>>, vector<1x8x8xbf16>
    %171 = vector.shape_cast %170 : vector<1x8x8xbf16> to vector<8x8xbf16>
    %172 = arith.truncf %169 : vector<8x256xf32> to vector<8x256xbf16>
    %cst_77 = arith.constant dense<0.000000e+00> : vector<8x256xf32>
    %173 = tpu.matmul %171, %172, %cst_77 {dimension_numbers = #tpu.dot_dimension_numbers<[1], [0], [0], [1], [0, 0, 1, 1], [], []>} : vector<8x8xbf16>, vector<8x256xbf16>, vector<8x256xf32> -> vector<8x256xf32>
    %c1_i32_78 = arith.constant 1 : i32
    %174 = tpu.dynamic_rotate %167 by %c1_i32_78 dim 1 : vector<8x256xf32>, i32 -> vector<8x256xf32>
    %175 = arith.select %20, %174, %5 : vector<8x256xi1>, vector<8x256xf32>
    %c16 = arith.constant 16 : index
    %c0_79 = arith.constant 0 : index
    %c0_80 = arith.constant 0 : index
    %176 = vector.load %arg2[%c16, %c0_79, %c0_80] : memref<40x8x8xbf16, #tpu.memory_space<vmem>>, vector<1x8x8xbf16>
    %177 = vector.shape_cast %176 : vector<1x8x8xbf16> to vector<8x8xbf16>
    %178 = arith.truncf %175 : vector<8x256xf32> to vector<8x256xbf16>
    %cst_81 = arith.constant dense<0.000000e+00> : vector<8x256xf32>
    %179 = tpu.matmul %177, %178, %cst_81 {dimension_numbers = #tpu.dot_dimension_numbers<[1], [0], [0], [1], [0, 0, 1, 1], [], []>} : vector<8x8xbf16>, vector<8x256xbf16>, vector<8x256xf32> -> vector<8x256xf32>
    %180 = arith.addf %173, %179 : vector<8x256xf32>
    %c17 = arith.constant 17 : index
    %c0_82 = arith.constant 0 : index
    %c0_83 = arith.constant 0 : index
    %181 = vector.load %arg2[%c17, %c0_82, %c0_83] : memref<40x8x8xbf16, #tpu.memory_space<vmem>>, vector<1x8x8xbf16>
    %182 = vector.shape_cast %181 : vector<1x8x8xbf16> to vector<8x8xbf16>
    %183 = arith.truncf %167 : vector<8x256xf32> to vector<8x256xbf16>
    %cst_84 = arith.constant dense<0.000000e+00> : vector<8x256xf32>
    %184 = tpu.matmul %182, %183, %cst_84 {dimension_numbers = #tpu.dot_dimension_numbers<[1], [0], [0], [1], [0, 0, 1, 1], [], []>} : vector<8x8xbf16>, vector<8x256xbf16>, vector<8x256xf32> -> vector<8x256xf32>
    %185 = arith.addf %180, %184 : vector<8x256xf32>
    %c255_i32_85 = arith.constant 255 : i32
    %186 = tpu.dynamic_rotate %167 by %c255_i32_85 dim 1 : vector<8x256xf32>, i32 -> vector<8x256xf32>
    %187 = arith.select %30, %186, %5 : vector<8x256xi1>, vector<8x256xf32>
    %c18 = arith.constant 18 : index
    %c0_86 = arith.constant 0 : index
    %c0_87 = arith.constant 0 : index
    %188 = vector.load %arg2[%c18, %c0_86, %c0_87] : memref<40x8x8xbf16, #tpu.memory_space<vmem>>, vector<1x8x8xbf16>
    %189 = vector.shape_cast %188 : vector<1x8x8xbf16> to vector<8x8xbf16>
    %190 = arith.truncf %187 : vector<8x256xf32> to vector<8x256xbf16>
    %cst_88 = arith.constant dense<0.000000e+00> : vector<8x256xf32>
    %191 = tpu.matmul %189, %190, %cst_88 {dimension_numbers = #tpu.dot_dimension_numbers<[1], [0], [0], [1], [0, 0, 1, 1], [], []>} : vector<8x8xbf16>, vector<8x256xbf16>, vector<8x256xf32> -> vector<8x256xf32>
    %192 = arith.addf %185, %191 : vector<8x256xf32>
    %c254_i32_89 = arith.constant 254 : i32
    %193 = tpu.dynamic_rotate %167 by %c254_i32_89 dim 1 : vector<8x256xf32>, i32 -> vector<8x256xf32>
    %194 = arith.select %40, %193, %5 : vector<8x256xi1>, vector<8x256xf32>
    %c19 = arith.constant 19 : index
    %c0_90 = arith.constant 0 : index
    %c0_91 = arith.constant 0 : index
    %195 = vector.load %arg2[%c19, %c0_90, %c0_91] : memref<40x8x8xbf16, #tpu.memory_space<vmem>>, vector<1x8x8xbf16>
    %196 = vector.shape_cast %195 : vector<1x8x8xbf16> to vector<8x8xbf16>
    %197 = arith.truncf %194 : vector<8x256xf32> to vector<8x256xbf16>
    %cst_92 = arith.constant dense<0.000000e+00> : vector<8x256xf32>
    %198 = tpu.matmul %196, %197, %cst_92 {dimension_numbers = #tpu.dot_dimension_numbers<[1], [0], [0], [1], [0, 0, 1, 1], [], []>} : vector<8x8xbf16>, vector<8x256xbf16>, vector<8x256xf32> -> vector<8x256xf32>
    %199 = arith.addf %192, %198 : vector<8x256xf32>
    %cst_93 = arith.constant 0.000000e+00 : f32
    %200 = vector.broadcast %cst_93 : f32 to vector<8x256xf32>
    %201 = arith.maximumf %199, %200 : vector<8x256xf32>
    %cst_94 = arith.constant 2.000000e+00 : f32
    %202 = vector.broadcast %cst_94 : f32 to vector<8x256xf32>
    %203 = arith.mulf %202, %201 : vector<8x256xf32>
    %c128_i32_95 = arith.constant 128 : i32
    %204 = tpu.dynamic_rotate %203 by %c128_i32_95 dim 1 : vector<8x256xf32>, i32 -> vector<8x256xf32>
    %205 = arith.addf %167, %204 : vector<8x256xf32>
    %c32_i32 = arith.constant 32 : i32
    %206 = tpu.dynamic_rotate %205 by %c32_i32 dim 1 : vector<8x256xf32>, i32 -> vector<8x256xf32>
    %207 = arith.select %15, %206, %5 : vector<8x256xi1>, vector<8x256xf32>
    %c20 = arith.constant 20 : index
    %c0_96 = arith.constant 0 : index
    %c0_97 = arith.constant 0 : index
    %208 = vector.load %arg2[%c20, %c0_96, %c0_97] : memref<40x8x8xbf16, #tpu.memory_space<vmem>>, vector<1x8x8xbf16>
    %209 = vector.shape_cast %208 : vector<1x8x8xbf16> to vector<8x8xbf16>
    %210 = arith.truncf %207 : vector<8x256xf32> to vector<8x256xbf16>
    %cst_98 = arith.constant dense<0.000000e+00> : vector<8x256xf32>
    %211 = tpu.matmul %209, %210, %cst_98 {dimension_numbers = #tpu.dot_dimension_numbers<[1], [0], [0], [1], [0, 0, 1, 1], [], []>} : vector<8x8xbf16>, vector<8x256xbf16>, vector<8x256xf32> -> vector<8x256xf32>
    %c16_i32 = arith.constant 16 : i32
    %212 = tpu.dynamic_rotate %205 by %c16_i32 dim 1 : vector<8x256xf32>, i32 -> vector<8x256xf32>
    %213 = arith.select %25, %212, %5 : vector<8x256xi1>, vector<8x256xf32>
    %c21 = arith.constant 21 : index
    %c0_99 = arith.constant 0 : index
    %c0_100 = arith.constant 0 : index
    %214 = vector.load %arg2[%c21, %c0_99, %c0_100] : memref<40x8x8xbf16, #tpu.memory_space<vmem>>, vector<1x8x8xbf16>
    %215 = vector.shape_cast %214 : vector<1x8x8xbf16> to vector<8x8xbf16>
    %216 = arith.truncf %213 : vector<8x256xf32> to vector<8x256xbf16>
    %cst_101 = arith.constant dense<0.000000e+00> : vector<8x256xf32>
    %217 = tpu.matmul %215, %216, %cst_101 {dimension_numbers = #tpu.dot_dimension_numbers<[1], [0], [0], [1], [0, 0, 1, 1], [], []>} : vector<8x8xbf16>, vector<8x256xbf16>, vector<8x256xf32> -> vector<8x256xf32>
    %218 = arith.addf %211, %217 : vector<8x256xf32>
    %c22 = arith.constant 22 : index
    %c0_102 = arith.constant 0 : index
    %c0_103 = arith.constant 0 : index
    %219 = vector.load %arg2[%c22, %c0_102, %c0_103] : memref<40x8x8xbf16, #tpu.memory_space<vmem>>, vector<1x8x8xbf16>
    %220 = vector.shape_cast %219 : vector<1x8x8xbf16> to vector<8x8xbf16>
    %221 = arith.truncf %205 : vector<8x256xf32> to vector<8x256xbf16>
    %cst_104 = arith.constant dense<0.000000e+00> : vector<8x256xf32>
    %222 = tpu.matmul %220, %221, %cst_104 {dimension_numbers = #tpu.dot_dimension_numbers<[1], [0], [0], [1], [0, 0, 1, 1], [], []>} : vector<8x8xbf16>, vector<8x256xbf16>, vector<8x256xf32> -> vector<8x256xf32>
    %223 = arith.addf %218, %222 : vector<8x256xf32>
    %c240_i32 = arith.constant 240 : i32
    %224 = tpu.dynamic_rotate %205 by %c240_i32 dim 1 : vector<8x256xf32>, i32 -> vector<8x256xf32>
    %225 = arith.select %35, %224, %5 : vector<8x256xi1>, vector<8x256xf32>
    %c23 = arith.constant 23 : index
    %c0_105 = arith.constant 0 : index
    %c0_106 = arith.constant 0 : index
    %226 = vector.load %arg2[%c23, %c0_105, %c0_106] : memref<40x8x8xbf16, #tpu.memory_space<vmem>>, vector<1x8x8xbf16>
    %227 = vector.shape_cast %226 : vector<1x8x8xbf16> to vector<8x8xbf16>
    %228 = arith.truncf %225 : vector<8x256xf32> to vector<8x256xbf16>
    %cst_107 = arith.constant dense<0.000000e+00> : vector<8x256xf32>
    %229 = tpu.matmul %227, %228, %cst_107 {dimension_numbers = #tpu.dot_dimension_numbers<[1], [0], [0], [1], [0, 0, 1, 1], [], []>} : vector<8x8xbf16>, vector<8x256xbf16>, vector<8x256xf32> -> vector<8x256xf32>
    %230 = arith.addf %223, %229 : vector<8x256xf32>
    %c224_i32 = arith.constant 224 : i32
    %231 = tpu.dynamic_rotate %205 by %c224_i32 dim 1 : vector<8x256xf32>, i32 -> vector<8x256xf32>
    %232 = arith.select %45, %231, %5 : vector<8x256xi1>, vector<8x256xf32>
    %c24 = arith.constant 24 : index
    %c0_108 = arith.constant 0 : index
    %c0_109 = arith.constant 0 : index
    %233 = vector.load %arg2[%c24, %c0_108, %c0_109] : memref<40x8x8xbf16, #tpu.memory_space<vmem>>, vector<1x8x8xbf16>
    %234 = vector.shape_cast %233 : vector<1x8x8xbf16> to vector<8x8xbf16>
    %235 = arith.truncf %232 : vector<8x256xf32> to vector<8x256xbf16>
    %cst_110 = arith.constant dense<0.000000e+00> : vector<8x256xf32>
    %236 = tpu.matmul %234, %235, %cst_110 {dimension_numbers = #tpu.dot_dimension_numbers<[1], [0], [0], [1], [0, 0, 1, 1], [], []>} : vector<8x8xbf16>, vector<8x256xbf16>, vector<8x256xf32> -> vector<8x256xf32>
    %237 = arith.addf %230, %236 : vector<8x256xf32>
    %cst_111 = arith.constant 0.000000e+00 : f32
    %238 = vector.broadcast %cst_111 : f32 to vector<8x256xf32>
    %239 = arith.maximumf %237, %238 : vector<8x256xf32>
    %cst_112 = arith.constant 2.000000e+00 : f32
    %240 = vector.broadcast %cst_112 : f32 to vector<8x256xf32>
    %241 = arith.mulf %240, %239 : vector<8x256xf32>
    %c252_i32 = arith.constant 252 : i32
    %242 = tpu.dynamic_rotate %241 by %c252_i32 dim 1 : vector<8x256xf32>, i32 -> vector<8x256xf32>
    %c12_i32_113 = arith.constant 12 : i32
    %243 = tpu.dynamic_rotate %241 by %c12_i32_113 dim 1 : vector<8x256xf32>, i32 -> vector<8x256xf32>
    %244 = arith.select %47, %242, %243 : vector<8x256xi1>, vector<8x256xf32>
    %245 = arith.addf %205, %244 : vector<8x256xf32>
    %c32_i32_114 = arith.constant 32 : i32
    %246 = tpu.dynamic_rotate %245 by %c32_i32_114 dim 1 : vector<8x256xf32>, i32 -> vector<8x256xf32>
    %247 = arith.select %15, %246, %5 : vector<8x256xi1>, vector<8x256xf32>
    %c25 = arith.constant 25 : index
    %c0_115 = arith.constant 0 : index
    %c0_116 = arith.constant 0 : index
    %248 = vector.load %arg2[%c25, %c0_115, %c0_116] : memref<40x8x8xbf16, #tpu.memory_space<vmem>>, vector<1x8x8xbf16>
    %249 = vector.shape_cast %248 : vector<1x8x8xbf16> to vector<8x8xbf16>
    %250 = arith.truncf %247 : vector<8x256xf32> to vector<8x256xbf16>
    %cst_117 = arith.constant dense<0.000000e+00> : vector<8x256xf32>
    %251 = tpu.matmul %249, %250, %cst_117 {dimension_numbers = #tpu.dot_dimension_numbers<[1], [0], [0], [1], [0, 0, 1, 1], [], []>} : vector<8x8xbf16>, vector<8x256xbf16>, vector<8x256xf32> -> vector<8x256xf32>
    %c16_i32_118 = arith.constant 16 : i32
    %252 = tpu.dynamic_rotate %245 by %c16_i32_118 dim 1 : vector<8x256xf32>, i32 -> vector<8x256xf32>
    %253 = arith.select %25, %252, %5 : vector<8x256xi1>, vector<8x256xf32>
    %c26 = arith.constant 26 : index
    %c0_119 = arith.constant 0 : index
    %c0_120 = arith.constant 0 : index
    %254 = vector.load %arg2[%c26, %c0_119, %c0_120] : memref<40x8x8xbf16, #tpu.memory_space<vmem>>, vector<1x8x8xbf16>
    %255 = vector.shape_cast %254 : vector<1x8x8xbf16> to vector<8x8xbf16>
    %256 = arith.truncf %253 : vector<8x256xf32> to vector<8x256xbf16>
    %cst_121 = arith.constant dense<0.000000e+00> : vector<8x256xf32>
    %257 = tpu.matmul %255, %256, %cst_121 {dimension_numbers = #tpu.dot_dimension_numbers<[1], [0], [0], [1], [0, 0, 1, 1], [], []>} : vector<8x8xbf16>, vector<8x256xbf16>, vector<8x256xf32> -> vector<8x256xf32>
    %258 = arith.addf %251, %257 : vector<8x256xf32>
    %c27 = arith.constant 27 : index
    %c0_122 = arith.constant 0 : index
    %c0_123 = arith.constant 0 : index
    %259 = vector.load %arg2[%c27, %c0_122, %c0_123] : memref<40x8x8xbf16, #tpu.memory_space<vmem>>, vector<1x8x8xbf16>
    %260 = vector.shape_cast %259 : vector<1x8x8xbf16> to vector<8x8xbf16>
    %261 = arith.truncf %245 : vector<8x256xf32> to vector<8x256xbf16>
    %cst_124 = arith.constant dense<0.000000e+00> : vector<8x256xf32>
    %262 = tpu.matmul %260, %261, %cst_124 {dimension_numbers = #tpu.dot_dimension_numbers<[1], [0], [0], [1], [0, 0, 1, 1], [], []>} : vector<8x8xbf16>, vector<8x256xbf16>, vector<8x256xf32> -> vector<8x256xf32>
    %263 = arith.addf %258, %262 : vector<8x256xf32>
    %c240_i32_125 = arith.constant 240 : i32
    %264 = tpu.dynamic_rotate %245 by %c240_i32_125 dim 1 : vector<8x256xf32>, i32 -> vector<8x256xf32>
    %265 = arith.select %35, %264, %5 : vector<8x256xi1>, vector<8x256xf32>
    %c28 = arith.constant 28 : index
    %c0_126 = arith.constant 0 : index
    %c0_127 = arith.constant 0 : index
    %266 = vector.load %arg2[%c28, %c0_126, %c0_127] : memref<40x8x8xbf16, #tpu.memory_space<vmem>>, vector<1x8x8xbf16>
    %267 = vector.shape_cast %266 : vector<1x8x8xbf16> to vector<8x8xbf16>
    %268 = arith.truncf %265 : vector<8x256xf32> to vector<8x256xbf16>
    %cst_128 = arith.constant dense<0.000000e+00> : vector<8x256xf32>
    %269 = tpu.matmul %267, %268, %cst_128 {dimension_numbers = #tpu.dot_dimension_numbers<[1], [0], [0], [1], [0, 0, 1, 1], [], []>} : vector<8x8xbf16>, vector<8x256xbf16>, vector<8x256xf32> -> vector<8x256xf32>
    %270 = arith.addf %263, %269 : vector<8x256xf32>
    %c224_i32_129 = arith.constant 224 : i32
    %271 = tpu.dynamic_rotate %245 by %c224_i32_129 dim 1 : vector<8x256xf32>, i32 -> vector<8x256xf32>
    %272 = arith.select %45, %271, %5 : vector<8x256xi1>, vector<8x256xf32>
    %c29 = arith.constant 29 : index
    %c0_130 = arith.constant 0 : index
    %c0_131 = arith.constant 0 : index
    %273 = vector.load %arg2[%c29, %c0_130, %c0_131] : memref<40x8x8xbf16, #tpu.memory_space<vmem>>, vector<1x8x8xbf16>
    %274 = vector.shape_cast %273 : vector<1x8x8xbf16> to vector<8x8xbf16>
    %275 = arith.truncf %272 : vector<8x256xf32> to vector<8x256xbf16>
    %cst_132 = arith.constant dense<0.000000e+00> : vector<8x256xf32>
    %276 = tpu.matmul %274, %275, %cst_132 {dimension_numbers = #tpu.dot_dimension_numbers<[1], [0], [0], [1], [0, 0, 1, 1], [], []>} : vector<8x8xbf16>, vector<8x256xbf16>, vector<8x256xf32> -> vector<8x256xf32>
    %277 = arith.addf %270, %276 : vector<8x256xf32>
    %cst_133 = arith.constant 0.000000e+00 : f32
    %278 = vector.broadcast %cst_133 : f32 to vector<8x256xf32>
    %279 = arith.maximumf %277, %278 : vector<8x256xf32>
    %cst_134 = arith.constant 2.000000e+00 : f32
    %280 = vector.broadcast %cst_134 : f32 to vector<8x256xf32>
    %281 = arith.mulf %280, %279 : vector<8x256xf32>
    %c248_i32 = arith.constant 248 : i32
    %282 = tpu.dynamic_rotate %281 by %c248_i32 dim 1 : vector<8x256xf32>, i32 -> vector<8x256xf32>
    %c8_i32_135 = arith.constant 8 : i32
    %283 = tpu.dynamic_rotate %281 by %c8_i32_135 dim 1 : vector<8x256xf32>, i32 -> vector<8x256xf32>
    %284 = arith.select %49, %282, %283 : vector<8x256xi1>, vector<8x256xf32>
    %285 = arith.addf %245, %284 : vector<8x256xf32>
    %c32_i32_136 = arith.constant 32 : i32
    %286 = tpu.dynamic_rotate %285 by %c32_i32_136 dim 1 : vector<8x256xf32>, i32 -> vector<8x256xf32>
    %287 = arith.select %15, %286, %5 : vector<8x256xi1>, vector<8x256xf32>
    %c30 = arith.constant 30 : index
    %c0_137 = arith.constant 0 : index
    %c0_138 = arith.constant 0 : index
    %288 = vector.load %arg2[%c30, %c0_137, %c0_138] : memref<40x8x8xbf16, #tpu.memory_space<vmem>>, vector<1x8x8xbf16>
    %289 = vector.shape_cast %288 : vector<1x8x8xbf16> to vector<8x8xbf16>
    %290 = arith.truncf %287 : vector<8x256xf32> to vector<8x256xbf16>
    %cst_139 = arith.constant dense<0.000000e+00> : vector<8x256xf32>
    %291 = tpu.matmul %289, %290, %cst_139 {dimension_numbers = #tpu.dot_dimension_numbers<[1], [0], [0], [1], [0, 0, 1, 1], [], []>} : vector<8x8xbf16>, vector<8x256xbf16>, vector<8x256xf32> -> vector<8x256xf32>
    %c16_i32_140 = arith.constant 16 : i32
    %292 = tpu.dynamic_rotate %285 by %c16_i32_140 dim 1 : vector<8x256xf32>, i32 -> vector<8x256xf32>
    %293 = arith.select %25, %292, %5 : vector<8x256xi1>, vector<8x256xf32>
    %c31 = arith.constant 31 : index
    %c0_141 = arith.constant 0 : index
    %c0_142 = arith.constant 0 : index
    %294 = vector.load %arg2[%c31, %c0_141, %c0_142] : memref<40x8x8xbf16, #tpu.memory_space<vmem>>, vector<1x8x8xbf16>
    %295 = vector.shape_cast %294 : vector<1x8x8xbf16> to vector<8x8xbf16>
    %296 = arith.truncf %293 : vector<8x256xf32> to vector<8x256xbf16>
    %cst_143 = arith.constant dense<0.000000e+00> : vector<8x256xf32>
    %297 = tpu.matmul %295, %296, %cst_143 {dimension_numbers = #tpu.dot_dimension_numbers<[1], [0], [0], [1], [0, 0, 1, 1], [], []>} : vector<8x8xbf16>, vector<8x256xbf16>, vector<8x256xf32> -> vector<8x256xf32>
    %298 = arith.addf %291, %297 : vector<8x256xf32>
    %c32 = arith.constant 32 : index
    %c0_144 = arith.constant 0 : index
    %c0_145 = arith.constant 0 : index
    %299 = vector.load %arg2[%c32, %c0_144, %c0_145] : memref<40x8x8xbf16, #tpu.memory_space<vmem>>, vector<1x8x8xbf16>
    %300 = vector.shape_cast %299 : vector<1x8x8xbf16> to vector<8x8xbf16>
    %301 = arith.truncf %285 : vector<8x256xf32> to vector<8x256xbf16>
    %cst_146 = arith.constant dense<0.000000e+00> : vector<8x256xf32>
    %302 = tpu.matmul %300, %301, %cst_146 {dimension_numbers = #tpu.dot_dimension_numbers<[1], [0], [0], [1], [0, 0, 1, 1], [], []>} : vector<8x8xbf16>, vector<8x256xbf16>, vector<8x256xf32> -> vector<8x256xf32>
    %303 = arith.addf %298, %302 : vector<8x256xf32>
    %c240_i32_147 = arith.constant 240 : i32
    %304 = tpu.dynamic_rotate %285 by %c240_i32_147 dim 1 : vector<8x256xf32>, i32 -> vector<8x256xf32>
    %305 = arith.select %35, %304, %5 : vector<8x256xi1>, vector<8x256xf32>
    %c33 = arith.constant 33 : index
    %c0_148 = arith.constant 0 : index
    %c0_149 = arith.constant 0 : index
    %306 = vector.load %arg2[%c33, %c0_148, %c0_149] : memref<40x8x8xbf16, #tpu.memory_space<vmem>>, vector<1x8x8xbf16>
    %307 = vector.shape_cast %306 : vector<1x8x8xbf16> to vector<8x8xbf16>
    %308 = arith.truncf %305 : vector<8x256xf32> to vector<8x256xbf16>
    %cst_150 = arith.constant dense<0.000000e+00> : vector<8x256xf32>
    %309 = tpu.matmul %307, %308, %cst_150 {dimension_numbers = #tpu.dot_dimension_numbers<[1], [0], [0], [1], [0, 0, 1, 1], [], []>} : vector<8x8xbf16>, vector<8x256xbf16>, vector<8x256xf32> -> vector<8x256xf32>
    %310 = arith.addf %303, %309 : vector<8x256xf32>
    %c224_i32_151 = arith.constant 224 : i32
    %311 = tpu.dynamic_rotate %285 by %c224_i32_151 dim 1 : vector<8x256xf32>, i32 -> vector<8x256xf32>
    %312 = arith.select %45, %311, %5 : vector<8x256xi1>, vector<8x256xf32>
    %c34 = arith.constant 34 : index
    %c0_152 = arith.constant 0 : index
    %c0_153 = arith.constant 0 : index
    %313 = vector.load %arg2[%c34, %c0_152, %c0_153] : memref<40x8x8xbf16, #tpu.memory_space<vmem>>, vector<1x8x8xbf16>
    %314 = vector.shape_cast %313 : vector<1x8x8xbf16> to vector<8x8xbf16>
    %315 = arith.truncf %312 : vector<8x256xf32> to vector<8x256xbf16>
    %cst_154 = arith.constant dense<0.000000e+00> : vector<8x256xf32>
    %316 = tpu.matmul %314, %315, %cst_154 {dimension_numbers = #tpu.dot_dimension_numbers<[1], [0], [0], [1], [0, 0, 1, 1], [], []>} : vector<8x8xbf16>, vector<8x256xbf16>, vector<8x256xf32> -> vector<8x256xf32>
    %317 = arith.addf %310, %316 : vector<8x256xf32>
    %cst_155 = arith.constant 0.000000e+00 : f32
    %318 = vector.broadcast %cst_155 : f32 to vector<8x256xf32>
    %319 = arith.maximumf %317, %318 : vector<8x256xf32>
    %cst_156 = arith.constant 2.000000e+00 : f32
    %320 = vector.broadcast %cst_156 : f32 to vector<8x256xf32>
    %321 = arith.mulf %320, %319 : vector<8x256xf32>
    %c244_i32 = arith.constant 244 : i32
    %322 = tpu.dynamic_rotate %321 by %c244_i32 dim 1 : vector<8x256xf32>, i32 -> vector<8x256xf32>
    %c4_i32_157 = arith.constant 4 : i32
    %323 = tpu.dynamic_rotate %321 by %c4_i32_157 dim 1 : vector<8x256xf32>, i32 -> vector<8x256xf32>
    %324 = arith.select %51, %322, %323 : vector<8x256xi1>, vector<8x256xf32>
    %325 = arith.addf %285, %324 : vector<8x256xf32>
    %c32_i32_158 = arith.constant 32 : i32
    %326 = tpu.dynamic_rotate %325 by %c32_i32_158 dim 1 : vector<8x256xf32>, i32 -> vector<8x256xf32>
    %327 = arith.select %15, %326, %5 : vector<8x256xi1>, vector<8x256xf32>
    %c35 = arith.constant 35 : index
    %c0_159 = arith.constant 0 : index
    %c0_160 = arith.constant 0 : index
    %328 = vector.load %arg2[%c35, %c0_159, %c0_160] : memref<40x8x8xbf16, #tpu.memory_space<vmem>>, vector<1x8x8xbf16>
    %329 = vector.shape_cast %328 : vector<1x8x8xbf16> to vector<8x8xbf16>
    %330 = arith.truncf %327 : vector<8x256xf32> to vector<8x256xbf16>
    %cst_161 = arith.constant dense<0.000000e+00> : vector<8x256xf32>
    %331 = tpu.matmul %329, %330, %cst_161 {dimension_numbers = #tpu.dot_dimension_numbers<[1], [0], [0], [1], [0, 0, 1, 1], [], []>} : vector<8x8xbf16>, vector<8x256xbf16>, vector<8x256xf32> -> vector<8x256xf32>
    %c16_i32_162 = arith.constant 16 : i32
    %332 = tpu.dynamic_rotate %325 by %c16_i32_162 dim 1 : vector<8x256xf32>, i32 -> vector<8x256xf32>
    %333 = arith.select %25, %332, %5 : vector<8x256xi1>, vector<8x256xf32>
    %c36 = arith.constant 36 : index
    %c0_163 = arith.constant 0 : index
    %c0_164 = arith.constant 0 : index
    %334 = vector.load %arg2[%c36, %c0_163, %c0_164] : memref<40x8x8xbf16, #tpu.memory_space<vmem>>, vector<1x8x8xbf16>
    %335 = vector.shape_cast %334 : vector<1x8x8xbf16> to vector<8x8xbf16>
    %336 = arith.truncf %333 : vector<8x256xf32> to vector<8x256xbf16>
    %cst_165 = arith.constant dense<0.000000e+00> : vector<8x256xf32>
    %337 = tpu.matmul %335, %336, %cst_165 {dimension_numbers = #tpu.dot_dimension_numbers<[1], [0], [0], [1], [0, 0, 1, 1], [], []>} : vector<8x8xbf16>, vector<8x256xbf16>, vector<8x256xf32> -> vector<8x256xf32>
    %338 = arith.addf %331, %337 : vector<8x256xf32>
    %c37 = arith.constant 37 : index
    %c0_166 = arith.constant 0 : index
    %c0_167 = arith.constant 0 : index
    %339 = vector.load %arg2[%c37, %c0_166, %c0_167] : memref<40x8x8xbf16, #tpu.memory_space<vmem>>, vector<1x8x8xbf16>
    %340 = vector.shape_cast %339 : vector<1x8x8xbf16> to vector<8x8xbf16>
    %341 = arith.truncf %325 : vector<8x256xf32> to vector<8x256xbf16>
    %cst_168 = arith.constant dense<0.000000e+00> : vector<8x256xf32>
    %342 = tpu.matmul %340, %341, %cst_168 {dimension_numbers = #tpu.dot_dimension_numbers<[1], [0], [0], [1], [0, 0, 1, 1], [], []>} : vector<8x8xbf16>, vector<8x256xbf16>, vector<8x256xf32> -> vector<8x256xf32>
    %343 = arith.addf %338, %342 : vector<8x256xf32>
    %c240_i32_169 = arith.constant 240 : i32
    %344 = tpu.dynamic_rotate %325 by %c240_i32_169 dim 1 : vector<8x256xf32>, i32 -> vector<8x256xf32>
    %345 = arith.select %35, %344, %5 : vector<8x256xi1>, vector<8x256xf32>
    %c38 = arith.constant 38 : index
    %c0_170 = arith.constant 0 : index
    %c0_171 = arith.constant 0 : index
    %346 = vector.load %arg2[%c38, %c0_170, %c0_171] : memref<40x8x8xbf16, #tpu.memory_space<vmem>>, vector<1x8x8xbf16>
    %347 = vector.shape_cast %346 : vector<1x8x8xbf16> to vector<8x8xbf16>
    %348 = arith.truncf %345 : vector<8x256xf32> to vector<8x256xbf16>
    %cst_172 = arith.constant dense<0.000000e+00> : vector<8x256xf32>
    %349 = tpu.matmul %347, %348, %cst_172 {dimension_numbers = #tpu.dot_dimension_numbers<[1], [0], [0], [1], [0, 0, 1, 1], [], []>} : vector<8x8xbf16>, vector<8x256xbf16>, vector<8x256xf32> -> vector<8x256xf32>
    %350 = arith.addf %343, %349 : vector<8x256xf32>
    %c224_i32_173 = arith.constant 224 : i32
    %351 = tpu.dynamic_rotate %325 by %c224_i32_173 dim 1 : vector<8x256xf32>, i32 -> vector<8x256xf32>
    %352 = arith.select %45, %351, %5 : vector<8x256xi1>, vector<8x256xf32>
    %c39 = arith.constant 39 : index
    %c0_174 = arith.constant 0 : index
    %c0_175 = arith.constant 0 : index
    %353 = vector.load %arg2[%c39, %c0_174, %c0_175] : memref<40x8x8xbf16, #tpu.memory_space<vmem>>, vector<1x8x8xbf16>
    %354 = vector.shape_cast %353 : vector<1x8x8xbf16> to vector<8x8xbf16>
    %355 = arith.truncf %352 : vector<8x256xf32> to vector<8x256xbf16>
    %cst_176 = arith.constant dense<0.000000e+00> : vector<8x256xf32>
    %356 = tpu.matmul %354, %355, %cst_176 {dimension_numbers = #tpu.dot_dimension_numbers<[1], [0], [0], [1], [0, 0, 1, 1], [], []>} : vector<8x8xbf16>, vector<8x256xbf16>, vector<8x256xf32> -> vector<8x256xf32>
    %357 = arith.addf %350, %356 : vector<8x256xf32>
    %cst_177 = arith.constant 0.000000e+00 : f32
    %358 = vector.broadcast %cst_177 : f32 to vector<8x256xf32>
    %359 = arith.maximumf %357, %358 : vector<8x256xf32>
    %cst_178 = arith.constant 2.000000e+00 : f32
    %360 = vector.broadcast %cst_178 : f32 to vector<8x256xf32>
    %361 = arith.mulf %360, %359 : vector<8x256xf32>
    %c248_i32_179 = arith.constant 248 : i32
    %362 = tpu.dynamic_rotate %361 by %c248_i32_179 dim 1 : vector<8x256xf32>, i32 -> vector<8x256xf32>
    %c8_i32_180 = arith.constant 8 : i32
    %363 = tpu.dynamic_rotate %361 by %c8_i32_180 dim 1 : vector<8x256xf32>, i32 -> vector<8x256xf32>
    %364 = arith.select %49, %362, %363 : vector<8x256xi1>, vector<8x256xf32>
    %365 = arith.addf %325, %364 : vector<8x256xf32>
    %c0_181 = arith.constant 0 : index
    %c0_182 = arith.constant 0 : index
    %c0_183 = arith.constant 0 : index
    %366 = vector.load %arg4[%c0_181, %c0_182, %c0_183] : memref<1x8x256xf32, #tpu.memory_space<vmem>>, vector<1x8x256xf32>
    %367 = vector.shape_cast %366 : vector<1x8x256xf32> to vector<8x256xf32>
    %368 = vector.shape_cast %365 : vector<8x256xf32> to vector<1x8x256xf32>
    tpu.vector_store %arg4[%c0_181, %c0_182, %c0_183], %368 {strides = array<i32>} : memref<1x8x256xf32, #tpu.memory_space<vmem>>, vector<1x8x256xf32>,
    %c0_184 = arith.constant 0 : index
    %c0_185 = arith.constant 0 : index
    %c0_186 = arith.constant 0 : index
    %369 = vector.load %arg3[%c0_184, %c0_185, %c0_186] : memref<1x1x256xi32, #tpu.memory_space<vmem>>, vector<1x1x256xi32>
    %370 = vector.shape_cast %369 : vector<1x1x256xi32> to vector<1x256xi32>
    %371 = tpu.iota {dimensions = array<i32: 0>} : vector<8x256xi32>
    %c5_i32 = arith.constant 5 : i32
    %372 = vector.broadcast %c5_i32 : i32 to vector<8x256xi32>
    %373 = arith.cmpi slt, %371, %372 : vector<8x256xi32>
    %cst_187 = arith.constant 0xFF800000 : f32
    %374 = vector.broadcast %cst_187 : f32 to vector<8x256xf32>
    %375 = arith.select %373, %365, %374 : vector<8x256xi1>, vector<8x256xf32>
    %cst_188 = arith.constant dense<0xFF800000> : vector<256xf32>
    %376 = vector.multi_reduction <maximumf>, %375, %cst_188 [0] : vector<8x256xf32> to vector<256xf32>
    %377 = vector.shape_cast %376 : vector<256xf32> to vector<1x256xf32>
    %378 = vector.broadcast %377 : vector<1x256xf32> to vector<8x256xf32>
    %379 = arith.subf %365, %378 : vector<8x256xf32>
    %380 = math.exp %379 : vector<8x256xf32>
    %381 = arith.select %373, %380, %5 : vector<8x256xi1>, vector<8x256xf32>
    %cst_189 = arith.constant dense<0.000000e+00> : vector<256xf32>
    %382 = vector.multi_reduction <add>, %381, %cst_189 [0] : vector<8x256xf32> to vector<256xf32>
    %383 = vector.shape_cast %382 : vector<256xf32> to vector<1x256xf32>
    %384 = tpu.reciprocal %383 {approx = true} : vector<1x256xf32> -> vector<1x256xf32>
    %385 = vector.broadcast %384 : vector<1x256xf32> to vector<8x256xf32>
    %386 = arith.mulf %381, %385 : vector<8x256xf32>
    %c1_i32_190 = arith.constant 1 : i32
    %387 = vector.broadcast %c1_i32_190 : i32 to vector<8x256xi32>
    %388 = arith.cmpi sge, %371, %387 : vector<8x256xi32>
    %389 = arith.andi %388, %373 : vector<8x256xi1>
    %390 = arith.extui %389 : vector<8x256xi1> to vector<8x256xi32>
    %391 = arith.sitofp %390 : vector<8x256xi32> to vector<8x256xf32>
    %392 = vector.broadcast %370 : vector<1x256xi32> to vector<8x256xi32>
    %393 = arith.cmpi eq, %371, %392 : vector<8x256xi32>
    %394 = arith.extui %393 : vector<8x256xi1> to vector<8x256xi32>
    %395 = arith.sitofp %394 : vector<8x256xi32> to vector<8x256xf32>
    %396 = arith.mulf %395, %391 : vector<8x256xf32>
    %397 = arith.mulf %386, %391 : vector<8x256xf32>
    %398 = arith.mulf %397, %396 : vector<8x256xf32>
    %cst_191 = arith.constant dense<0.000000e+00> : vector<8xf32>
    %399 = vector.multi_reduction <add>, %398, %cst_191 [1] : vector<8x256xf32> to vector<8xf32>
    %400 = vector.shape_cast %399 : vector<8xf32> to vector<8x1xf32>
    %cst_192 = arith.constant dense<0.000000e+00> : vector<1xf32>
    %401 = vector.multi_reduction <add>, %400, %cst_192 [0] : vector<8x1xf32> to vector<1xf32>
    %402 = vector.shape_cast %401 : vector<1xf32> to vector<1x1xf32>
    %403 = arith.mulf %397, %397 : vector<8x256xf32>
    %cst_193 = arith.constant dense<0.000000e+00> : vector<8xf32>
    %404 = vector.multi_reduction <add>, %403, %cst_193 [1] : vector<8x256xf32> to vector<8xf32>
    %405 = vector.shape_cast %404 : vector<8xf32> to vector<8x1xf32>
    %cst_194 = arith.constant dense<0.000000e+00> : vector<1xf32>
    %406 = vector.multi_reduction <add>, %405, %cst_194 [0] : vector<8x1xf32> to vector<1xf32>
    %407 = vector.shape_cast %406 : vector<1xf32> to vector<1x1xf32>
    %cst_195 = arith.constant 1.000000e-03 : f32
    %408 = vector.broadcast %cst_195 : f32 to vector<1x1xf32>
    %409 = arith.addf %407, %408 : vector<1x1xf32>
    %410 = arith.mulf %396, %396 : vector<8x256xf32>
    %cst_196 = arith.constant dense<0.000000e+00> : vector<8xf32>
    %411 = vector.multi_reduction <add>, %410, %cst_196 [1] : vector<8x256xf32> to vector<8xf32>
    %412 = vector.shape_cast %411 : vector<8xf32> to vector<8x1xf32>
    %cst_197 = arith.constant dense<0.000000e+00> : vector<1xf32>
    %413 = vector.multi_reduction <add>, %412, %cst_197 [0] : vector<8x1xf32> to vector<1xf32>
    %414 = vector.shape_cast %413 : vector<1xf32> to vector<1x1xf32>
    %cst_198 = arith.constant 1.000000e-03 : f32
    %415 = vector.broadcast %cst_198 : f32 to vector<1x1xf32>
    %416 = arith.addf %414, %415 : vector<1x1xf32>
    %cst_199 = arith.constant 2.000000e+00 : f32
    %417 = vector.broadcast %cst_199 : f32 to vector<1x1xf32>
    %418 = arith.mulf %417, %402 : vector<1x1xf32>
    %419 = arith.addf %409, %416 : vector<1x1xf32>
    %420 = arith.divf %418, %419 : vector<1x1xf32>
    %cst_200 = arith.constant 1.000000e+00 : f32
    %421 = vector.broadcast %cst_200 : f32 to vector<1x1xf32>
    %422 = arith.subf %421, %420 : vector<1x1xf32>
    %c0_201 = arith.constant 0 : index
    %c0_202 = arith.constant 0 : index
    %c0_203 = arith.constant 0 : index
    %423 = vector.load %arg5[%c0_201, %c0_202, %c0_203] : memref<1x1x1xf32, #tpu.memory_space<vmem>>, vector<1x1x1xf32>
    %424 = vector.shape_cast %423 : vector<1x1x1xf32> to vector<1x1xf32>
    %425 = vector.shape_cast %422 : vector<1x1xf32> to vector<1x1x1xf32>
    tpu.vector_store %arg5[%c0_201, %c0_202, %c0_203], %425 {strides = array<i32>} : memref<1x1x1xf32, #tpu.memory_space<vmem>>, vector<1x1x1xf32>,
    return
  }
  func.func @transform_0(%arg0: i32) -> (i32, i32, i32) {
    %c0_i32 = arith.constant 0 : i32
    %c0_i32_0 = arith.constant 0 : i32
    %c0_i32_1 = arith.constant 0 : i32
    return %arg0, %c0_i32, %c0_i32_0 : i32, i32, i32
  }
  func.func @transform_1(%arg0: i32) -> (i32, i32, i32) {
    %c0_i32 = arith.constant 0 : i32
    %c0_i32_0 = arith.constant 0 : i32
    %c0_i32_1 = arith.constant 0 : i32
    %c0_i32_2 = arith.constant 0 : i32
    return %c0_i32, %c0_i32_0, %c0_i32_1 : i32, i32, i32
  }
  func.func @transform_2(%arg0: i32) -> (i32, i32, i32) {
    %c0_i32 = arith.constant 0 : i32
    %c0_i32_0 = arith.constant 0 : i32
    %c0_i32_1 = arith.constant 0 : i32
    return %arg0, %c0_i32, %c0_i32_0 : i32, i32, i32
  }
  func.func @transform_3(%arg0: i32) -> (i32, i32, i32) {
    %c0_i32 = arith.constant 0 : i32
    %c0_i32_0 = arith.constant 0 : i32
    %c0_i32_1 = arith.constant 0 : i32
    return %arg0, %c0_i32, %c0_i32_0 : i32, i32, i32
  }
  func.func @transform_4(%arg0: i32) -> (i32, i32, i32) {
    %c0_i32 = arith.constant 0 : i32
    %c0_i32_0 = arith.constant 0 : i32
    %c0_i32_1 = arith.constant 0 : i32
    return %arg0, %c0_i32, %c0_i32_0 : i32, i32, i32
  }
}

</mosaic_0001>

<bundles_post_ra>
// kernel: _lambda_.1
= control target key start
LH: loop header
LB: loop body
LE: loop exit
PB: predicated region body
PF: predicated region fallthrough
CT: control target
= control target key end

     0   :  { %s3593_s15 = smov 0   ;;  %s4450_s0 = inlined_call_operand.vmem [shape: f32[2,8,256], index: 0, kind: input, shape index: {}]   ;;  %s4451_s1 = inlined_call_operand.vmem [shape: bf16[40,8,8], index: 1, kind: input, shape index: {}]   ;;  %s4452_s2 = inlined_call_operand.vmem [shape: s32[2,1,256], index: 2, kind: input, shape index: {}]   ;;  %s4453_s3 = inlined_call_operand.vmem [shape: f32[2,8,256], index: 3, kind: output, shape index: {0}]   ;;  %s4454_s4 = inlined_call_operand.vmem [shape: f32[2,1,1], index: 4, kind: output, shape index: {1}]  }
   0x1 LB: > { %s3084_s16 = sadd.s32 4294967295, %s3549_s15   ;;  %p3088_p0 = scmp.ge.s32.totalorder %s3549_s15, 1  ;;  %s3549_s15 = sphi %s3593_s15, %s15_s15  }
   0x2   : > { %p174_p1 = scmp.lt.s32.totalorder %s3549_s15, 3 }
   0x4   : > { %p175_p2 = pnand %p3088_p0, %p174_p1 }
   0x5   : > { %p207_p3 = scmp.lt.s32.totalorder (!%p175_p2), %s3084_s16, 1  ;;  %v3551_v0 = vmov (!%p175_p2), 0   ;;  %s3552_s21 = smov (!%p175_p2), 1   ;;  %v225_v4 = vlaneseq (!%p175_p2)  ;;  %vm317_vm3 = vcmask (!%p175_p2), 1043456   ;;  %v3094_v25 = vld [vmem:[%s4451_s1 + $0x4] sm:$0xf] (!%p175_p2) }
   0x6   : > { %178 = sbr.rel (%p175_p2) target bundleno = 4120 (0x1018), region = 32  ;;  %356 = vmatprep.mubr.bf16.mxu0 (!%p175_p2), %v3551_v0  ;;  %679 = vmatprep.mubr.bf16.mxu1 (!%p175_p2), %v3551_v0  ;;  %s3553_s22 = smov (!%p175_p2), 127   ;;  %vm313_vm7 = vcmask (!%p175_p2), 64512   ;;  %v297_v37 = vld [vmem:[%s4451_s1] sm:$0xf] (!%p175_p2) }
   0x7   : > { %s3554_s23 = smov (!%p175_p2), 2   ;;  %s3555_s24 = smov (!%p175_p2), 126   ;;  %v3622_v5 = vand.u32 (!%p175_p2), 127, %v225_v4  ;;  %v3099_v48 = vld [vmem:[%s4451_s1 + $0x8] sm:$0xf] (!%p175_p2) }
   0x8   : > { %v3102_v54 = vld [vmem:[%s4451_s1 + $0xc] sm:$0xf] (!%p175_p2)  ;;  %v3105_v56 = vld [vmem:[%s4451_s1 + $0x10] sm:$0xf] (!%p175_p2)  ;;  %s3556_s9 = smov (!%p175_p2), 64   ;;  %s3558_s25 = smov (!%p175_p2), 16  }
   0x9   : > { %v3625_v6 = vadd.s32 (!%p175_p2), 128, %v3622_v5  ;;  %v3631_v8 = vand.u32 (!%p175_p2), 15, %v3622_v5  ;;  %vm304_vm0 = vcmp.lt.s32.totalorder (!%p175_p2), %v3622_v5, 1  ;;  %vm292_vm4 = vcmp.lt.s32.totalorder (!%p175_p2), %v3622_v5, 2  ;;  %s3559_s26 = smov (!%p175_p2), 96   ;;  %s3560_s27 = smov (!%p175_p2), 112  }
   0xa   : > { %vm475_vm8 = vcmp.lt.s32.totalorder (!%p175_p2), %v3622_v5, 127  ;;  %vm540_vm11 = vcmp.lt.s32.totalorder (!%p175_p2), %v3622_v5, 126  ;;  %vm609_vm14 = vcmp.lt.s32.totalorder (!%p175_p2), %v3622_v5, 64  ;;  %s3563_s5 = smov (!%p175_p2), 120   ;;  %s3564_s6 = smov (!%p175_p2), 8  }
   0xb   : > { %v3628_v7 = vand.u32 (!%p175_p2), 15, %v3625_v6  ;;  %vm244_vm2 = vcmp.ge.s32.totalorder (!%p175_p2), %v3631_v8, 1  ;;  %vm232_vm6 = vcmp.ge.s32.totalorder (!%p175_p2), %v3631_v8, 2  ;;  %vm258_vm10 = vcmp.lt.s32.totalorder (!%p175_p2), %v3631_v8, 15  ;;  %s3565_s13 = smov (!%p175_p2), 116   ;;  %s3566_s14 = smov (!%p175_p2), 4  }
   0xc   : > { %vm270_vm13 = vcmp.lt.s32.totalorder (!%p175_p2), %v3631_v8, 14 }
   0xd   : > { %s4496_s16 = smov (!%p207_p3, %s3084_s16), 1  ;;  %vm245_vm1 = vcmp.ge.s32.totalorder %v3628_v7, 1  ;;  %vm233_vm5 = vcmp.ge.s32.totalorder %v3628_v7, 2  ;;  %vm259_vm9 = vcmp.lt.s32.totalorder %v3628_v7, 15  ;;  %vm271_vm12 = vcmp.lt.s32.totalorder %v3628_v7, 14 }
   0xe   : > { %s3218_s17 = sshll.u32 %s4496_s16, 4  ;;  %s3091_s8 = sshll.u32 %s4496_s16, 1 }
   0xf   : > { %s211_s20 = scalar_lea.vmem %s4450_s0, %s3218_s17 }
  0x10   : > { %v3611_v1 = vld [vmem:[%s211_s20] sm:$0xff]  ;;  %v3613_v2 = vld [vmem:[%s211_s20 + $0x8] sm:$0xff]  ;;  %s3557_s20 = smov 32  }
  0x11   : > { %v3373_v3 = vpack.i.bf16 %v3613_v2, %v3611_v1  ;;  %v418_v30 = vpack.c.bf16 %v3613_v2, %v3613_v2  ;;  %v417_v35 = vpack.c.bf16 %v3611_v1, %v3611_v1 }
  0x13   : > { %3374 = vrot.lane.b32.xlu0 %v3373_v3, %s3552_s21  ;;  %3384 = vrot.lane.b32.xlu1 %v3373_v3, %s3553_s22  ;;  %v423_v39 = vsel %vm317_vm3, %v417_v35, 0 }
  0x17   : > { %3379 = vrot.lane.b32.xlu0 %v3373_v3, %s3554_s23  ;;  %3389 = vrot.lane.b32.xlu1 %v3373_v3, %s3555_s24 }
  0x85   : > { %v3375_v9 = vpop.permute.xlu0 %3374  ;;  %v3385_v27 = vpop.permute.xlu1 %3384 }
  0x86   : > { %v3377_v10 = vunpack.i.h.bf16 %v3375_v9  ;;  %v3376_v11 = vunpack.i.l.bf16 %v3375_v9  ;;  %v3387_v32 = vunpack.i.h.bf16 %v3385_v27  ;;  %v3386_v33 = vunpack.i.l.bf16 %v3385_v27 }
  0x88   : > { %v305_v12 = vsel %vm304_vm0, %v3376_v11, %v3377_v10  ;;  %v306_v13 = vsel %vm304_vm0, %v3377_v10, %v3376_v11  ;;  %v477_v34 = vsel %vm475_vm8, %v3387_v32, %v3386_v33  ;;  %v476_v41 = vsel %vm475_vm8, %v3386_v33, %v3387_v32  ;;  %v3109_v33 = vld [vmem:[%s4451_s1 + $0x18] sm:$0xf] }
  0x89   : > { %v308_v14 = vsel %vm245_vm1, %v305_v12, 0.0  ;;  %v3380_v15 = vpop.permute.xlu0 %3379  ;;  %v307_v16 = vsel %vm244_vm2, %v306_v13, 0.0  ;;  %v479_v36 = vsel %vm259_vm9, %v477_v34, 0.0  ;;  %v3390_v38 = vpop.permute.xlu1 %3389  ;;  %v478_v44 = vsel %vm258_vm10, %v476_v41, 0.0 }
  0x8a   : > { %v312_v17 = vpack.c.bf16 %v308_v14, %v308_v14  ;;  %v3382_v18 = vunpack.i.h.bf16 %v3380_v15  ;;  %v3381_v19 = vunpack.i.l.bf16 %v3380_v15  ;;  %v311_v20 = vpack.c.bf16 %v307_v16, %v307_v16 }
  0x8b   : > { %v483_v40 = vpack.c.bf16 %v479_v36, %v479_v36  ;;  %v3392_v42 = vunpack.i.h.bf16 %v3390_v38  ;;  %v3391_v43 = vunpack.i.l.bf16 %v3390_v38  ;;  %v482_v46 = vpack.c.bf16 %v478_v44, %v478_v44 }
  0x8c   : > { %3095 = vmatprep.subr.msk.bf16.mxu0 %vm317_vm3, %v312_v17  ;;  %v293_v21 = vsel %vm292_vm4, %v3381_v19, %v3382_v18  ;;  %v294_v22 = vsel %vm292_vm4, %v3382_v18, %v3381_v19  ;;  %v319_v23 = vsel %vm317_vm3, %v311_v20, 0 }
  0x8d   : > { %v296_v24 = vsel %vm233_vm5, %v293_v21, 0.0  ;;  %325 = vmatpush1.bf16.msra.mxu0 %v319_v23  ;;  %v295_v26 = vsel %vm232_vm6, %v294_v22, 0.0  ;;  %v542_v45 = vsel %vm540_vm11, %v3392_v42, %v3391_v43  ;;  %v488_v49 = vsel %vm317_vm3, %v482_v46, 0 }
  0x8e   : > { %v299_v28 = vpack.c.bf16 %v296_v24, %v296_v24  ;;  %v298_v29 = vpack.c.bf16 %v295_v26, %v295_v26  ;;  %v544_v47 = vsel %vm271_vm12, %v542_v45, 0.0  ;;  %v541_v51 = vsel %vm540_vm11, %v3391_v43, %v3392_v42  ;;  %v3108_v42 = vld [vmem:[%s4451_s1 + $0x14] sm:$0xf] }
  0x8f   : > { %v548_v50 = vpack.c.bf16 %v544_v47, %v544_v47  ;;  %v543_v52 = vsel %vm270_vm13, %v541_v51, 0.0 }
  0x90   : > { %3096 = vmatmul.mubr.msk.bf16.vlgmr.msra.gmra.mrb[0].mxu0 %vm313_vm7, %v3094_v25  ;;  %3097 = vmatprep.subr.msk.bf16.mxu0 %vm317_vm3, %v299_v28  ;;  %v369_v31 = vsel %vm317_vm3, %v298_v29, 0  ;;  %v547_v53 = vpack.c.bf16 %v543_v52, %v543_v52 }
  0x91   : > { %375 = vmatpush1.bf16.msra.mxu0 %v369_v31  ;;  %406 = vmatprep.mubr.bf16.mxu0 %v3551_v0 }
  0x92   : > { %3100 = vmatprep.subr.msk.bf16.mxu0 %vm317_vm3, %v418_v30  ;;  %v553_v55 = vsel %vm317_vm3, %v547_v53, 0  ;;  %v3114_v53 = vld [vmem:[%s4451_s1 + $0x1c] sm:$0xf] }
  0x9c   : > { %3098 = vmatmul.mubr.msk.bf16.vlgmr.msra.gmra.mrb[0].mxu0 %vm313_vm7, %v297_v37 }
  0x9d   : > { %429 = vmatpush1.bf16.msra.mxu0 %v423_v39  ;;  %460 = vmatprep.mubr.bf16.mxu0 %v3551_v0 }
  0x9e   : > { %3103 = vmatprep.subr.msk.bf16.mxu0 %vm317_vm3, %v483_v40 }
  0xa8   : > { %3101 = vmatmul.mubr.msk.bf16.vlgmr.msra.gmra.mrb[0].mxu0 %vm313_vm7, %v3099_v48 }
  0xa9   : > { %494 = vmatpush1.bf16.msra.mxu0 %v488_v49  ;;  %525 = vmatprep.mubr.bf16.mxu0 %v3551_v0 }
  0xaa   : > { %3106 = vmatprep.subr.msk.bf16.mxu0 %vm317_vm3, %v548_v50 }
  0xb4   : > { %3104 = vmatmul.mubr.msk.bf16.vlgmr.msra.gmra.mrb[0].mxu0 %vm313_vm7, %v3102_v54 }
  0xb5   : > { %559 = vmatpush1.bf16.msra.mxu0 %v553_v55  ;;  %590 = vmatprep.mubr.bf16.mxu0 %v3551_v0 }
  0xc0   : > { %3107 = vmatmul.mubr.msk.bf16.vlgmr.msra.gmra.mrb[0].mxu0 %vm313_vm7, %v3105_v56 }
  0xc1   : > { %993 = vmatprep.mubr.bf16.mxu0 %v3551_v0 }
 0x193   : > { %v592_v57 = vpop.f32.mrb[0].mxu0 }
 0x194   : > { %v601_v58 = vmax.f32 %v592_v57, 0.0  ;;  %v594_v59 = vpop.f32.mrb[1].mxu0 }
 0x195   : > { %v602_v60 = vmax.f32 %v594_v59, 0.0  ;;  %v596_v61 = vpop.f32.mrb[2].mxu0  ;;  %v3117_v59 = vld [vmem:[%s4451_s1 + $0x20] sm:$0xf] }
 0x196   : > { %v603_v62 = vmul.f32 2.0, %v601_v58  ;;  %v597_v63 = vpop.f32.mrb[3].mxu0  ;;  %v3120_v61 = vld [vmem:[%s4451_s1 + $0x24] sm:$0xf] }
 0x197   : > { %v604_v3 = vmul.f32 2.0, %v602_v60 }
 0x198   : > { %605 = vrot.lane.b32.xlu0 %v603_v62, %s3556_s9 }
 0x199   : > { %607 = vrot.lane.b32.xlu1 %v604_v3, %s3556_s9 }
 0x20a   : > { %v606_v9 = vpop.permute.xlu0 %605 }
 0x20b   : > { %v608_v10 = vpop.permute.xlu1 %607 }
 0x20c   : > { %v610_v11 = vsel %vm609_vm14, %v606_v9, %v608_v10  ;;  %v611_v12 = vsel %vm609_vm14, %v608_v10, %v606_v9 }
 0x20d   : > { %v3724_v13 = vadd.f32 %v610_v11, %v3611_v1  ;;  %v3727_v14 = vadd.f32 %v611_v12, %v3613_v2 }
 0x20f   : > { %v3398_v15 = vpack.i.bf16 %v3727_v14, %v3724_v13  ;;  %v741_v36 = vpack.c.bf16 %v3727_v14, %v3727_v14  ;;  %v740_v40 = vpack.c.bf16 %v3724_v13, %v3724_v13 }
 0x211   : > { %3399 = vrot.lane.b32.xlu1 %v3398_v15, %s3554_s23  ;;  %3394 = vrot.lane.b32.xlu0 %v3398_v15, %s3552_s21  ;;  %v746_v44 = vsel %vm317_vm3, %v740_v40, 0 }
 0x215   : > { %3409 = vrot.lane.b32.xlu1 %v3398_v15, %s3555_s24  ;;  %3404 = vrot.lane.b32.xlu0 %v3398_v15, %s3553_s22 }
 0x283   : > { %v3400_v16 = vpop.permute.xlu1 %3399  ;;  %v3395_v17 = vpop.permute.xlu0 %3394 }
 0x284   : > { %v3402_v18 = vunpack.i.h.bf16 %v3400_v16  ;;  %v3401_v19 = vunpack.i.l.bf16 %v3400_v16  ;;  %v3397_v1 = vunpack.i.h.bf16 %v3395_v17  ;;  %v3396_v20 = vunpack.i.l.bf16 %v3395_v17 }
 0x286   : > { %v618_v2 = vsel %vm292_vm4, %v3401_v19, %v3402_v18  ;;  %v619_v21 = vsel %vm292_vm4, %v3402_v18, %v3401_v19  ;;  %v630_v22 = vsel %vm304_vm0, %v3396_v20, %v3397_v1  ;;  %v631_v23 = vsel %vm304_vm0, %v3397_v1, %v3396_v20 }
 0x287   : > { %v633_v24 = vsel %vm245_vm1, %v630_v22, 0.0  ;;  %v632_v25 = vsel %vm244_vm2, %v631_v23, 0.0  ;;  %v621_v26 = vsel %vm233_vm5, %v618_v2, 0.0  ;;  %v620_v27 = vsel %vm232_vm6, %v619_v21, 0.0  ;;  %v3405_v34 = vpop.permute.xlu0 %3404  ;;  %v3410_v43 = vpop.permute.xlu1 %3409 }
 0x288   : > { %v637_v28 = vpack.c.bf16 %v633_v24, %v633_v24  ;;  %v636_v29 = vpack.c.bf16 %v632_v25, %v632_v25  ;;  %v625_v31 = vpack.c.bf16 %v621_v26, %v621_v26  ;;  %v624_v32 = vpack.c.bf16 %v620_v27, %v620_v27 }
 0x289   : > { %v3407_v37 = vunpack.i.h.bf16 %v3405_v34  ;;  %v3406_v38 = vunpack.i.l.bf16 %v3405_v34  ;;  %v3412_v46 = vunpack.i.h.bf16 %v3410_v43  ;;  %v3411_v47 = vunpack.i.l.bf16 %v3410_v43  ;;  %v3124_v34 = vld [vmem:[%s4451_s1 + $0x2c] sm:$0xf]  ;;  %v3123_v43 = vld [vmem:[%s4451_s1 + $0x28] sm:$0xf] }
 0x28a   : > { %3110 = vmatprep.subr.msk.bf16.mxu1 %vm317_vm3, %v637_v28  ;;  %v642_v30 = vsel %vm317_vm3, %v636_v29, 0  ;;  %v692_v35 = vsel %vm317_vm3, %v624_v32, 0 }
 0x28b   : > { %648 = vmatpush1.bf16.msra.mxu1 %v642_v30  ;;  %v799_v39 = vsel %vm475_vm8, %v3407_v37, %v3406_v38  ;;  %v798_v48 = vsel %vm475_vm8, %v3406_v38, %v3407_v37  ;;  %v863_v50 = vsel %vm540_vm11, %v3412_v46, %v3411_v47  ;;  %v862_v56 = vsel %vm540_vm11, %v3411_v47, %v3412_v46 }
 0x28c   : > { %3112 = vmatprep.subr.msk.bf16.mxu1 %vm317_vm3, %v625_v31  ;;  %v801_v41 = vsel %vm259_vm9, %v799_v39, 0.0  ;;  %v800_v49 = vsel %vm258_vm10, %v798_v48, 0.0  ;;  %v865_v52 = vsel %vm271_vm12, %v863_v50, 0.0  ;;  %v864_v57 = vsel %vm270_vm13, %v862_v56, 0.0 }
 0x28d   : > { %v805_v45 = vpack.c.bf16 %v801_v41, %v801_v41  ;;  %v804_v51 = vpack.c.bf16 %v800_v49, %v800_v49  ;;  %v869_v55 = vpack.c.bf16 %v865_v52, %v865_v52  ;;  %v868_v58 = vpack.c.bf16 %v864_v57, %v864_v57 }
 0x28e   : > { %3111 = vmatmul.mubr.msk.bf16.vlgmr.msra.gmra.mrb[0].mxu1 %vm313_vm7, %v3109_v33 }
 0x28f   : > { %698 = vmatpush1.bf16.msra.mxu1 %v692_v35  ;;  %729 = vmatprep.mubr.bf16.mxu1 %v3551_v0  ;;  %v810_v54 = vsel %vm317_vm3, %v804_v51, 0  ;;  %v874_v60 = vsel %vm317_vm3, %v868_v58, 0 }
 0x290   : > { %3115 = vmatprep.subr.msk.bf16.mxu1 %vm317_vm3, %v741_v36 }
 0x29a   : > { %3113 = vmatmul.mubr.msk.bf16.vlgmr.msra.gmra.mrb[0].mxu1 %vm313_vm7, %v3108_v42 }
 0x29b   : > { %752 = vmatpush1.bf16.msra.mxu1 %v746_v44  ;;  %783 = vmatprep.mubr.bf16.mxu1 %v3551_v0 }
 0x29c   : > { %3118 = vmatprep.subr.msk.bf16.mxu1 %vm317_vm3, %v805_v45 }
 0x2a6   : > { %3116 = vmatmul.mubr.msk.bf16.vlgmr.msra.gmra.mrb[0].mxu1 %vm313_vm7, %v3114_v53 }
 0x2a7   : > { %816 = vmatpush1.bf16.msra.mxu1 %v810_v54  ;;  %847 = vmatprep.mubr.bf16.mxu1 %v3551_v0  ;;  %v3129_v54 = vld [vmem:[%s4451_s1 + $0x30] sm:$0xf] }
 0x2a8   : > { %3121 = vmatprep.subr.msk.bf16.mxu1 %vm317_vm3, %v869_v55 }
 0x2b2   : > { %3119 = vmatmul.mubr.msk.bf16.vlgmr.msra.gmra.mrb[0].mxu1 %vm313_vm7, %v3117_v59 }
 0x2b3   : > { %880 = vmatpush1.bf16.msra.mxu1 %v874_v60  ;;  %911 = vmatprep.mubr.bf16.mxu1 %v3551_v0  ;;  %v3132_v60 = vld [vmem:[%s4451_s1 + $0x34] sm:$0xf] }
 0x2be   : > { %3122 = vmatmul.mubr.msk.bf16.vlgmr.msra.gmra.mrb[0].mxu1 %vm313_vm7, %v3120_v61 }
 0x2bf   : > { %1313 = vmatprep.mubr.bf16.mxu1 %v3551_v0 }
 0x391   : > { %v913_v62 = vpop.f32.mrb[0].mxu1 }
 0x392   : > { %v922_v63 = vmax.f32 %v913_v62, 0.0  ;;  %v915_v3 = vpop.f32.mrb[1].mxu1  ;;  %v3135_v62 = vld [vmem:[%s4451_s1 + $0x38] sm:$0xf] }
 0x393   : > { %v923_v9 = vmax.f32 %v915_v3, 0.0  ;;  %v917_v10 = vpop.f32.mrb[2].mxu1 }
 0x394   : > { %v924_v11 = vmul.f32 2.0, %v922_v63  ;;  %v918_v12 = vpop.f32.mrb[3].mxu1 }
 0x395   : > { %v925_v15 = vmul.f32 2.0, %v923_v9 }
 0x396   : > { %v3807_v16 = vadd.f32 %v924_v11, %v3727_v14 }
 0x397   : > { %v3810_v17 = vadd.f32 %v925_v15, %v3724_v13 }
 0x398   : > { %v1055_v37 = vpack.c.bf16 %v3807_v16, %v3807_v16 }
 0x399   : > { %v3418_v18 = vpack.i.bf16 %v3807_v16, %v3810_v17  ;;  %v1054_v41 = vpack.c.bf16 %v3810_v17, %v3810_v17 }
 0x39b   : > { %3419 = vrot.lane.b32.xlu1 %v3418_v18, %s3554_s23  ;;  %3414 = vrot.lane.b32.xlu0 %v3418_v18, %s3552_s21  ;;  %v1060_v45 = vsel %vm317_vm3, %v1054_v41, 0 }
 0x39f   : > { %3429 = vrot.lane.b32.xlu1 %v3418_v18, %s3555_s24  ;;  %3424 = vrot.lane.b32.xlu0 %v3418_v18, %s3553_s22 }
 0x40d   : > { %v3420_v19 = vpop.permute.xlu1 %3419  ;;  %v3415_v1 = vpop.permute.xlu0 %3414 }
 0x40e   : > { %v3422_v20 = vunpack.i.h.bf16 %v3420_v19  ;;  %v3421_v2 = vunpack.i.l.bf16 %v3420_v19  ;;  %v3417_v14 = vunpack.i.h.bf16 %v3415_v1  ;;  %v3416_v21 = vunpack.i.l.bf16 %v3415_v1 }
 0x410   : > { %v932_v13 = vsel %vm292_vm4, %v3421_v2, %v3422_v20  ;;  %v933_v22 = vsel %vm292_vm4, %v3422_v20, %v3421_v2  ;;  %v944_v23 = vsel %vm304_vm0, %v3416_v21, %v3417_v14  ;;  %v945_v24 = vsel %vm304_vm0, %v3417_v14, %v3416_v21 }
 0x411   : > { %v947_v25 = vsel %vm245_vm1, %v944_v23, 0.0  ;;  %v946_v26 = vsel %vm244_vm2, %v945_v24, 0.0  ;;  %v935_v27 = vsel %vm233_vm5, %v932_v13, 0.0  ;;  %v934_v28 = vsel %vm232_vm6, %v933_v22, 0.0  ;;  %v3425_v35 = vpop.permute.xlu0 %3424  ;;  %v3430_v44 = vpop.permute.xlu1 %3429 }
 0x412   : > { %v951_v29 = vpack.c.bf16 %v947_v25, %v947_v25  ;;  %v950_v30 = vpack.c.bf16 %v946_v26, %v946_v26  ;;  %v939_v32 = vpack.c.bf16 %v935_v27, %v935_v27  ;;  %v938_v33 = vpack.c.bf16 %v934_v28, %v934_v28 }
 0x413   : > { %v3427_v38 = vunpack.i.h.bf16 %v3425_v35  ;;  %v3426_v39 = vunpack.i.l.bf16 %v3425_v35  ;;  %v3432_v47 = vunpack.i.h.bf16 %v3430_v44  ;;  %v3431_v48 = vunpack.i.l.bf16 %v3430_v44 }
 0x414   : > { %3125 = vmatprep.subr.msk.bf16.mxu0 %vm317_vm3, %v951_v29  ;;  %v956_v31 = vsel %vm317_vm3, %v950_v30, 0  ;;  %v1006_v36 = vsel %vm317_vm3, %v938_v33, 0 }
 0x415   : > { %962 = vmatpush1.bf16.msra.mxu0 %v956_v31  ;;  %v1113_v40 = vsel %vm475_vm8, %v3427_v38, %v3426_v39  ;;  %v1112_v49 = vsel %vm475_vm8, %v3426_v39, %v3427_v38  ;;  %v1177_v51 = vsel %vm540_vm11, %v3432_v47, %v3431_v48  ;;  %v1176_v57 = vsel %vm540_vm11, %v3431_v48, %v3432_v47  ;;  %v3139_v39 = vld [vmem:[%s4451_s1 + $0x40] sm:$0xf]  ;;  %v3138_v48 = vld [vmem:[%s4451_s1 + $0x3c] sm:$0xf] }
 0x416   : > { %3127 = vmatprep.subr.msk.bf16.mxu0 %vm317_vm3, %v939_v32  ;;  %v1115_v42 = vsel %vm259_vm9, %v1113_v40, 0.0  ;;  %v1114_v50 = vsel %vm258_vm10, %v1112_v49, 0.0  ;;  %v1179_v53 = vsel %vm271_vm12, %v1177_v51, 0.0  ;;  %v1178_v58 = vsel %vm270_vm13, %v1176_v57, 0.0 }
 0x417   : > { %v1119_v46 = vpack.c.bf16 %v1115_v42, %v1115_v42  ;;  %v1118_v52 = vpack.c.bf16 %v1114_v50, %v1114_v50  ;;  %v1183_v56 = vpack.c.bf16 %v1179_v53, %v1179_v53  ;;  %v1182_v59 = vpack.c.bf16 %v1178_v58, %v1178_v58 }
 0x418   : > { %3126 = vmatmul.mubr.msk.bf16.vlgmr.msra.gmra.mrb[4].mxu0 %vm313_vm7, %v3124_v34 }
 0x419   : > { %1012 = vmatpush1.bf16.msra.mxu0 %v1006_v36  ;;  %1043 = vmatprep.mubr.bf16.mxu0 %v3551_v0  ;;  %v1124_v55 = vsel %vm317_vm3, %v1118_v52, 0  ;;  %v1188_v61 = vsel %vm317_vm3, %v1182_v59, 0  ;;  %v3144_v59 = vld [vmem:[%s4451_s1 + $0x44] sm:$0xf] }
 0x41a   : > { %3130 = vmatprep.subr.msk.bf16.mxu0 %vm317_vm3, %v1055_v37 }
 0x424   : > { %3128 = vmatmul.mubr.msk.bf16.vlgmr.msra.gmra.mrb[4].mxu0 %vm313_vm7, %v3123_v43 }
 0x425   : > { %1066 = vmatpush1.bf16.msra.mxu0 %v1060_v45  ;;  %1097 = vmatprep.mubr.bf16.mxu0 %v3551_v0 }
 0x426   : > { %3133 = vmatprep.subr.msk.bf16.mxu0 %vm317_vm3, %v1119_v46 }
 0x430   : > { %3131 = vmatmul.mubr.msk.bf16.vlgmr.msra.gmra.mrb[4].mxu0 %vm313_vm7, %v3129_v54 }
 0x431   : > { %1130 = vmatpush1.bf16.msra.mxu0 %v1124_v55  ;;  %1161 = vmatprep.mubr.bf16.mxu0 %v3551_v0 }
 0x432   : > { %3136 = vmatprep.subr.msk.bf16.mxu0 %vm317_vm3, %v1183_v56 }
 0x43c   : > { %3134 = vmatmul.mubr.msk.bf16.vlgmr.msra.gmra.mrb[4].mxu0 %vm313_vm7, %v3132_v60 }
 0x43d   : > { %1194 = vmatpush1.bf16.msra.mxu0 %v1188_v61  ;;  %1225 = vmatprep.mubr.bf16.mxu0 %v3551_v0 }
 0x448   : > { %3137 = vmatmul.mubr.msk.bf16.vlgmr.msra.gmra.mrb[4].mxu0 %vm313_vm7, %v3135_v62 }
 0x449   : > { %1629 = vmatprep.mubr.bf16.mxu0 %v3551_v0 }
 0x51b   : > { %v1227_v63 = vpop.f32.mrb[4].mxu0 }
 0x51c   : > { %v1236_v3 = vmax.f32 %v1227_v63, 0.0  ;;  %v1229_v9 = vpop.f32.mrb[5].mxu0 }
 0x51d   : > { %v1237_v10 = vmax.f32 %v1229_v9, 0.0  ;;  %v1231_v11 = vpop.f32.mrb[6].mxu0  ;;  %v3147_v9 = vld [vmem:[%s4451_s1 + $0x48] sm:$0xf] }
 0x51e   : > { %v1238_v12 = vmul.f32 2.0, %v1236_v3  ;;  %v1232_v15 = vpop.f32.mrb[7].mxu0  ;;  %v3150_v11 = vld [vmem:[%s4451_s1 + $0x4c] sm:$0xf] }
 0x51f   : > { %v1239_v18 = vmul.f32 2.0, %v1237_v10 }
 0x520   : > { %1240 = vrot.lane.b32.xlu0 %v1238_v12, %s3556_s9 }
 0x521   : > { %1242 = vrot.lane.b32.xlu1 %v1239_v18, %s3556_s9 }
 0x592   : > { %v1241_v19 = vpop.permute.xlu0 %1240 }
 0x593   : > { %v1243_v1 = vpop.permute.xlu1 %1242 }
 0x594   : > { %v1244_v20 = vsel %vm609_vm14, %v1241_v19, %v1243_v1  ;;  %v1245_v2 = vsel %vm609_vm14, %v1243_v1, %v1241_v19 }
 0x595   : > { %v3896_v14 = vadd.f32 %v1245_v2, %v3810_v17  ;;  %v3899_v21 = vadd.f32 %v1244_v20, %v3807_v16 }
 0x597   : > { %v3438_v13 = vpack.i.bf16 %v3899_v21, %v3896_v14  ;;  %v1375_v42 = vpack.c.bf16 %v3899_v21, %v3899_v21  ;;  %v1374_v46 = vpack.c.bf16 %v3896_v14, %v3896_v14 }
 0x599   : > { %3439 = vrot.lane.b32.xlu1 %v3438_v13, %s3554_s23  ;;  %3434 = vrot.lane.b32.xlu0 %v3438_v13, %s3552_s21  ;;  %v1380_v50 = vsel %vm317_vm3, %v1374_v46, 0  ;;  %s3562_s23 = smov 12   ;;  %s215_s21 = scalar_lea.vmem %s4452_s2, %s3091_s8 }
 0x59d   : > { %3449 = vrot.lane.b32.xlu1 %v3438_v13, %s3555_s24  ;;  %3444 = vrot.lane.b32.xlu0 %v3438_v13, %s3553_s22  ;;  %s3561_s22 = smov 124   ;;  %s223_s24 = scalar_lea.vmem %s4454_s4, %s4496_s16 }
 0x60b   : > { %v3440_v22 = vpop.permute.xlu1 %3439  ;;  %v3435_v23 = vpop.permute.xlu0 %3434 }
 0x60c   : > { %v3442_v24 = vunpack.i.h.bf16 %v3440_v22  ;;  %v3441_v25 = vunpack.i.l.bf16 %v3440_v22  ;;  %v3437_v17 = vunpack.i.h.bf16 %v3435_v23  ;;  %v3436_v26 = vunpack.i.l.bf16 %v3435_v23 }
 0x60e   : > { %v1252_v16 = vsel %vm292_vm4, %v3441_v25, %v3442_v24  ;;  %v1253_v27 = vsel %vm292_vm4, %v3442_v24, %v3441_v25  ;;  %v1264_v28 = vsel %vm304_vm0, %v3436_v26, %v3437_v17  ;;  %v1265_v29 = vsel %vm304_vm0, %v3437_v17, %v3436_v26  ;;  %v3199_v17 = vld [vmem:[%s4451_s1 + $0x90] sm:$0xf] }
 0x60f   : > { %v1267_v30 = vsel %vm245_vm1, %v1264_v28, 0.0  ;;  %v1266_v31 = vsel %vm244_vm2, %v1265_v29, 0.0  ;;  %v1255_v32 = vsel %vm233_vm5, %v1252_v16, 0.0  ;;  %v1254_v33 = vsel %vm232_vm6, %v1253_v27, 0.0  ;;  %v3445_v40 = vpop.permute.xlu0 %3444  ;;  %v3450_v49 = vpop.permute.xlu1 %3449 }
 0x610   : > { %v1271_v34 = vpack.c.bf16 %v1267_v30, %v1267_v30  ;;  %v1270_v35 = vpack.c.bf16 %v1266_v31, %v1266_v31  ;;  %v1259_v37 = vpack.c.bf16 %v1255_v32, %v1255_v32  ;;  %v1258_v38 = vpack.c.bf16 %v1254_v33, %v1254_v33 }
 0x611   : > { %v3447_v43 = vunpack.i.h.bf16 %v3445_v40  ;;  %v3446_v44 = vunpack.i.l.bf16 %v3445_v40  ;;  %v3452_v52 = vunpack.i.h.bf16 %v3450_v49  ;;  %v3451_v53 = vunpack.i.l.bf16 %v3450_v49 }
 0x612   : > { %3140 = vmatprep.subr.msk.bf16.mxu1 %vm317_vm3, %v1271_v34  ;;  %v1276_v36 = vsel %vm317_vm3, %v1270_v35, 0  ;;  %v1326_v41 = vsel %vm317_vm3, %v1258_v38, 0 }
 0x613   : > { %1282 = vmatpush1.bf16.msra.mxu1 %v1276_v36  ;;  %v1433_v45 = vsel %vm475_vm8, %v3447_v43, %v3446_v44  ;;  %v1432_v54 = vsel %vm475_vm8, %v3446_v44, %v3447_v43  ;;  %v1497_v56 = vsel %vm540_vm11, %v3452_v52, %v3451_v53  ;;  %v1496_v62 = vsel %vm540_vm11, %v3451_v53, %v3452_v52 }
 0x614   : > { %3142 = vmatprep.subr.msk.bf16.mxu1 %vm317_vm3, %v1259_v37  ;;  %v1435_v47 = vsel %vm259_vm9, %v1433_v45, 0.0  ;;  %v1434_v55 = vsel %vm258_vm10, %v1432_v54, 0.0  ;;  %v1499_v58 = vsel %vm271_vm12, %v1497_v56, 0.0  ;;  %v1498_v63 = vsel %vm270_vm13, %v1496_v62, 0.0  ;;  %v3154_v45 = vld [vmem:[%s4451_s1 + $0x54] sm:$0xf] }
 0x615   : > { %v1439_v51 = vpack.c.bf16 %v1435_v47, %v1435_v47  ;;  %v1438_v57 = vpack.c.bf16 %v1434_v55, %v1434_v55  ;;  %v1503_v61 = vpack.c.bf16 %v1499_v58, %v1499_v58  ;;  %v1502_v3 = vpack.c.bf16 %v1498_v63, %v1498_v63  ;;  %v3153_v55 = vld [vmem:[%s4451_s1 + $0x50] sm:$0xf] }
 0x616   : > { %3141 = vmatmul.mubr.msk.bf16.vlgmr.msra.gmra.mrb[4].mxu1 %vm313_vm7, %v3139_v39  ;;  %vm1566_vm10 = vcmp.lt.s32.totalorder %v3622_v5, 32  ;;  %vm4455_vm12 = vcmp.lt.s32.totalorder %v3622_v5, 16 }
 0x617   : > { %1332 = vmatpush1.bf16.msra.mxu1 %v1326_v41  ;;  %1363 = vmatprep.mubr.bf16.mxu1 %v3551_v0  ;;  %v1444_v60 = vsel %vm317_vm3, %v1438_v57, 0  ;;  %v1508_v10 = vsel %vm317_vm3, %v1502_v3, 0 }
 0x618   : > { %3145 = vmatprep.subr.msk.bf16.mxu1 %vm317_vm3, %v1375_v42 }
 0x622   : > { %3143 = vmatmul.mubr.msk.bf16.vlgmr.msra.gmra.mrb[4].mxu1 %vm313_vm7, %v3138_v48 }
 0x623   : > { %1386 = vmatpush1.bf16.msra.mxu1 %v1380_v50  ;;  %1417 = vmatprep.mubr.bf16.mxu1 %v3551_v0 }
 0x624   : > { %3148 = vmatprep.subr.msk.bf16.mxu1 %vm317_vm3, %v1439_v51 }
 0x62e   : > { %3146 = vmatmul.mubr.msk.bf16.vlgmr.msra.gmra.mrb[4].mxu1 %vm313_vm7, %v3144_v59 }
 0x62f   : > { %1450 = vmatpush1.bf16.msra.mxu1 %v1444_v60  ;;  %1481 = vmatprep.mubr.bf16.mxu1 %v3551_v0 }
 0x630   : > { %3151 = vmatprep.subr.msk.bf16.mxu1 %vm317_vm3, %v1503_v61 }
 0x63a   : > { %3149 = vmatmul.mubr.msk.bf16.vlgmr.msra.gmra.mrb[4].mxu1 %vm313_vm7, %v3147_v9 }
 0x63b   : > { %1514 = vmatpush1.bf16.msra.mxu1 %v1508_v10  ;;  %1545 = vmatprep.mubr.bf16.mxu1 %v3551_v0 }
 0x646   : > { %3152 = vmatmul.mubr.msk.bf16.vlgmr.msra.gmra.mrb[4].mxu1 %vm313_vm7, %v3150_v11 }
 0x647   : > { %1961 = vmatprep.mubr.bf16.mxu1 %v3551_v0 }
 0x719   : > { %v1547_v12 = vpop.f32.mrb[4].mxu1 }
 0x71a   : > { %v1556_v15 = vmax.f32 %v1547_v12, 0.0  ;;  %v1549_v18 = vpop.f32.mrb[5].mxu1  ;;  %v3159_v12 = vld [vmem:[%s4451_s1 + $0x58] sm:$0xf] }
 0x71b   : > { %v1557_v19 = vmax.f32 %v1549_v18, 0.0  ;;  %v1551_v1 = vpop.f32.mrb[6].mxu1 }
 0x71c   : > { %v1558_v20 = vmul.f32 2.0, %v1556_v15  ;;  %v1552_v2 = vpop.f32.mrb[7].mxu1 }
 0x71d   : > { %v1559_v13 = vmul.f32 2.0, %v1557_v19 }
 0x71e   : > { %v3979_v22 = vadd.f32 %v1558_v20, %v3899_v21  ;;  %v3991_v21 = vshra.s32 %v3625_v6, 4 }
 0x71f   : > { %v3982_v23 = vadd.f32 %v1559_v13, %v3896_v14  ;;  %v3994_v14 = vshra.s32 %v3622_v5, 4  ;;  %v3162_v13 = vld [vmem:[%s4451_s1 + $0x5c] sm:$0xf] }
 0x720   : > { %vm239_vm15 = vcmp.ge.s32.totalorder %v3991_v21, 2  ;;  %vm241_vm0 = vcmp.lt.s32.totalorder %v3991_v21, 18  ;;  %vm251_vm1 = vcmp.ge.s32.totalorder %v3991_v21, 1  ;;  %vm253_vm2 = vcmp.lt.s32.totalorder %v3991_v21, 17 }
 0x721   : > { %v3458_v24 = vpack.i.bf16 %v3979_v22, %v3982_v23  ;;  %vm250_vm4 = vcmp.ge.s32.totalorder %v3994_v14, 1  ;;  %vm252_vm5 = vcmp.lt.s32.totalorder %v3994_v14, 17  ;;  %vm4002_vm6 = vmand %vm239_vm15, %vm241_vm0  ;;  %vm238_vm8 = vcmp.ge.s32.totalorder %v3994_v14, 2 }
 0x722   : > { %vm240_vm9 = vcmp.lt.s32.totalorder %v3994_v14, 18  ;;  %vm4009_vm11 = vmand %vm251_vm1, %vm253_vm2  ;;  %v1691_v48 = vpack.c.bf16 %v3979_v22, %v3979_v22  ;;  %vm263_vm15 = vcmp.ge.s32.totalorder %v3991_v21, 4294967295  ;;  %vm265_vm0 = vcmp.lt.s32.totalorder %v3991_v21, 15 }
 0x723   : > { %3459 = vrot.lane.b32.xlu1 %v3458_v24, %s3557_s20  ;;  %3454 = vrot.lane.b32.xlu0 %v3458_v24, %s3558_s25  ;;  %vm4014_vm13 = vmand %vm250_vm4, %vm252_vm5  ;;  %vm1748_vm1 = vcmp.lt.s32.totalorder %v3622_v5, 112  ;;  %v1690_v53 = vpack.c.bf16 %v3982_v23, %v3982_v23  ;;  %vm262_vm4 = vcmp.ge.s32.totalorder %v3994_v14, 4294967295  ;;  %vm264_vm5 = vcmp.lt.s32.totalorder %v3994_v14, 15 }
 0x724   : > { %vm4018_vm14 = vmand %vm238_vm8, %vm240_vm9  ;;  %vm275_vm9 = vcmp.ge.s32.totalorder %v3991_v21, 4294967294 }
 0x725   : > { %vm4053_vm2 = vmand %vm263_vm15, %vm265_vm0  ;;  %v1696_v57 = vsel %vm317_vm3, %v1690_v53, 0  ;;  %vm277_vm15 = vcmp.lt.s32.totalorder %v3991_v21, 14  ;;  %vm4456_vm0 = vcmp.lt.s32.totalorder %v3622_v5, 96  ;;  %v3165_v21 = vld [vmem:[%s4451_s1 + $0x60] sm:$0xf] }
 0x726   : > { %vm4074_vm8 = vmand %vm262_vm4, %vm264_vm5  ;;  %vm274_vm4 = vcmp.ge.s32.totalorder %v3994_v14, 4294967294  ;;  %vm276_vm5 = vcmp.lt.s32.totalorder %v3994_v14, 14 }
 0x727   : > { %3469 = vrot.lane.b32.xlu1 %v3458_v24, %s3559_s26  ;;  %3464 = vrot.lane.b32.xlu0 %v3458_v24, %s3560_s27 }
 0x795   : > { %v3460_v6 = vpop.permute.xlu1 %3459  ;;  %v3455_v26 = vpop.permute.xlu0 %3454 }
 0x796   : > { %v3462_v16 = vunpack.i.h.bf16 %v3460_v6  ;;  %v3461_v27 = vunpack.i.l.bf16 %v3460_v6  ;;  %v3457_v28 = vunpack.i.h.bf16 %v3455_v26  ;;  %v3456_v29 = vunpack.i.l.bf16 %v3455_v26 }
 0x798   : > { %v1567_v32 = vsel %vm1566_vm10, %v3461_v27, %v3462_v16  ;;  %v1568_v33 = vsel %vm1566_vm10, %v3462_v16, %v3461_v27  ;;  %v1580_v34 = vsel %vm4455_vm12, %v3456_v29, %v3457_v28  ;;  %v1581_v35 = vsel %vm4455_vm12, %v3457_v28, %v3456_v29  ;;  %vm4083_vm12 = vmand %vm275_vm9, %vm277_vm15 }
 0x799   : > { %v1583_v36 = vsel %vm4009_vm11, %v1580_v34, 0.0  ;;  %v1582_v37 = vsel %vm4014_vm13, %v1581_v35, 0.0  ;;  %v1570_v38 = vsel %vm4002_vm6, %v1567_v32, 0.0  ;;  %v1569_v39 = vsel %vm4018_vm14, %v1568_v33, 0.0  ;;  %v3465_v46 = vpop.permute.xlu0 %3464  ;;  %v3470_v56 = vpop.permute.xlu1 %3469  ;;  %vm4102_vm9 = vmand %vm274_vm4, %vm276_vm5 }
 0x79a   : > { %v1587_v40 = vpack.c.bf16 %v1583_v36, %v1583_v36  ;;  %v1586_v41 = vpack.c.bf16 %v1582_v37, %v1582_v37  ;;  %v1574_v43 = vpack.c.bf16 %v1570_v38, %v1570_v38  ;;  %v1573_v44 = vpack.c.bf16 %v1569_v39, %v1569_v39 }
 0x79b   : > { %v3467_v49 = vunpack.i.h.bf16 %v3465_v46  ;;  %v3466_v50 = vunpack.i.l.bf16 %v3465_v46  ;;  %v3472_v59 = vunpack.i.h.bf16 %v3470_v56  ;;  %v3471_v60 = vunpack.i.l.bf16 %v3470_v56 }
 0x79c   : > { %3155 = vmatprep.subr.msk.bf16.mxu0 %vm317_vm3, %v1587_v40  ;;  %v1592_v42 = vsel %vm317_vm3, %v1586_v41, 0  ;;  %v1642_v47 = vsel %vm317_vm3, %v1573_v44, 0  ;;  %vm1882_vm15 = vcmp.lt.s32.totalorder %v3622_v5, 124  ;;  %vm1889_vm4 = vcmp.lt.s32.totalorder %v3622_v5, 12 }
 0x79d   : > { %1598 = vmatpush1.bf16.msra.mxu0 %v1592_v42  ;;  %v1750_v52 = vsel %vm1748_vm1, %v3467_v49, %v3466_v50  ;;  %v1749_v61 = vsel %vm1748_vm1, %v3466_v50, %v3467_v49  ;;  %v1815_v9 = vsel %vm4456_vm0, %v3472_v59, %v3471_v60  ;;  %v1814_v19 = vsel %vm4456_vm0, %v3471_v60, %v3472_v59 }
 0x79e   : > { %3157 = vmatprep.subr.msk.bf16.mxu0 %vm317_vm3, %v1574_v43  ;;  %v1752_v54 = vsel %vm4053_vm2, %v1750_v52, 0.0  ;;  %v1751_v63 = vsel %vm4074_vm8, %v1749_v61, 0.0  ;;  %v1817_v11 = vsel %vm4083_vm12, %v1815_v9, 0.0  ;;  %v1816_v20 = vsel %vm4102_vm9, %v1814_v19, 0.0 }
 0x79f   : > { %v1756_v58 = vpack.c.bf16 %v1752_v54, %v1752_v54  ;;  %v1755_v10 = vpack.c.bf16 %v1751_v63, %v1751_v63  ;;  %v1821_v18 = vpack.c.bf16 %v1817_v11, %v1817_v11  ;;  %v1820_v2 = vpack.c.bf16 %v1816_v20, %v1816_v20 }
 0x7a0   : > { %3156 = vmatmul.mubr.msk.bf16.vlgmr.msra.gmra.mrb[8].mxu0 %vm313_vm7, %v3154_v45  ;;  %vm280_vm5 = vcmp.lt.s32.totalorder %v3631_v8, 12  ;;  %vm281_vm0 = vcmp.lt.s32.totalorder %v3628_v7, 12 }
 0x7a1   : > { %1648 = vmatpush1.bf16.msra.mxu0 %v1642_v47  ;;  %1679 = vmatprep.mubr.bf16.mxu0 %v3551_v0  ;;  %v1761_v15 = vsel %vm317_vm3, %v1755_v10, 0  ;;  %v1826_v24 = vsel %vm317_vm3, %v1820_v2, 0  ;;  %v3169_v10 = vld [vmem:[%s4451_s1 + $0x68] sm:$0xf] }
 0x7a2   : > { %3160 = vmatprep.subr.msk.bf16.mxu0 %vm317_vm3, %v1691_v48 }
 0x7ac   : > { %3158 = vmatmul.mubr.msk.bf16.vlgmr.msra.gmra.mrb[8].mxu0 %vm313_vm7, %v3153_v55 }
 0x7ad   : > { %1702 = vmatpush1.bf16.msra.mxu0 %v1696_v57  ;;  %1733 = vmatprep.mubr.bf16.mxu0 %v3551_v0 }
 0x7ae   : > { %3163 = vmatprep.subr.msk.bf16.mxu0 %vm317_vm3, %v1756_v58 }
 0x7b8   : > { %3161 = vmatmul.mubr.msk.bf16.vlgmr.msra.gmra.mrb[8].mxu0 %vm313_vm7, %v3159_v12 }
 0x7b9   : > { %1767 = vmatpush1.bf16.msra.mxu0 %v1761_v15  ;;  %1798 = vmatprep.mubr.bf16.mxu0 %v3551_v0 }
 0x7ba   : > { %3166 = vmatprep.subr.msk.bf16.mxu0 %vm317_vm3, %v1821_v18 }
 0x7c4   : > { %3164 = vmatmul.mubr.msk.bf16.vlgmr.msra.gmra.mrb[8].mxu0 %vm313_vm7, %v3162_v13 }
 0x7c5   : > { %1832 = vmatpush1.bf16.msra.mxu0 %v1826_v24  ;;  %1863 = vmatprep.mubr.bf16.mxu0 %v3551_v0  ;;  %v3168_v24 = vld [vmem:[%s4451_s1 + $0x64] sm:$0xf] }
 0x7d0   : > { %3167 = vmatmul.mubr.msk.bf16.vlgmr.msra.gmra.mrb[8].mxu0 %vm313_vm7, %v3165_v21 }
 0x7d1   : > { %2291 = vmatprep.mubr.bf16.mxu0 %v3551_v0 }
 0x8a3   : > { %v1865_v14 = vpop.f32.mrb[8].mxu0 }
 0x8a4   : > { %v1874_v6 = vmax.f32 %v1865_v14, 0.0  ;;  %v1867_v26 = vpop.f32.mrb[9].mxu0 }
 0x8a5   : > { %v1875_v16 = vmax.f32 %v1867_v26, 0.0  ;;  %v1869_v27 = vpop.f32.mrb[10].mxu0 }
 0x8a6   : > { %v1876_v28 = vmul.f32 2.0, %v1874_v6  ;;  %v1870_v29 = vpop.f32.mrb[11].mxu0 }
 0x8a7   : > { %v1877_v32 = vmul.f32 2.0, %v1875_v16 }
 0x8a8   : > { %1878 = vrot.lane.b32.xlu0 %v1876_v28, %s3561_s22 }
 0x8a9   : > { %1880 = vrot.lane.b32.xlu1 %v1877_v32, %s3561_s22  ;;  %s220_s22 = scalar_lea.vmem %s4453_s3, %s3218_s17 }
 0x8ac   : > { %1885 = vrot.lane.b32.xlu0 %v1876_v28, %s3562_s23 }
 0x8ad   : > { %1887 = vrot.lane.b32.xlu1 %v1877_v32, %s3562_s23 }
 0x91a   : > { %v1879_v33 = vpop.permute.xlu0 %1878 }
 0x91b   : > { %v1881_v34 = vpop.permute.xlu1 %1880 }
 0x91c   : > { %v1883_v37 = vsel %vm1882_vm15, %v1879_v33, %v1881_v34  ;;  %v1884_v38 = vsel %vm1882_vm15, %v1881_v34, %v1879_v33  ;;  %v3174_v34 = vld [vmem:[%s4451_s1 + $0x6c] sm:$0xf] }
 0x91e   : > { %v1886_v35 = vpop.permute.xlu0 %1885 }
 0x91f   : > { %v1888_v36 = vpop.permute.xlu1 %1887 }
 0x920   : > { %v1890_v39 = vsel %vm1889_vm4, %v1886_v35, %v1888_v36  ;;  %v1891_v40 = vsel %vm1889_vm4, %v1888_v36, %v1886_v35  ;;  %vm4479_vm4 = vcmp.lt.s32.totalorder %v3622_v5, 96 }
 0x921   : > { %v1892_v41 = vsel %vm280_vm5, %v1883_v37, %v1891_v40  ;;  %v1893_v42 = vsel %vm281_vm0, %v1884_v38, %v1890_v39  ;;  %vm4477_vm0 = vcmp.lt.s32.totalorder %v3622_v5, 16  ;;  %vm4480_vm5 = vmmov %vm4479_vm4  ;;  %v3177_v40 = vld [vmem:[%s4451_s1 + $0x70] sm:$0xf] }
 0x922   : > { %v4124_v43 = vadd.f32 %v1892_v41, %v3982_v23  ;;  %v4127_v44 = vadd.f32 %v1893_v42, %v3979_v22  ;;  %vm4478_vm15 = vmmov %vm4477_vm0  ;;  %v3180_v42 = vld [vmem:[%s4451_s1 + $0x74] sm:$0xf] }
 0x924   : > { %v3478_v45 = vpack.i.bf16 %v4127_v44, %v4124_v43  ;;  %v2023_v15 = vpack.c.bf16 %v4127_v44, %v4127_v44  ;;  %v2022_v2 = vpack.c.bf16 %v4124_v43, %v4124_v43 }
 0x926   : > { %3479 = vrot.lane.b32.xlu1 %v3478_v45, %s3557_s20  ;;  %3474 = vrot.lane.b32.xlu0 %v3478_v45, %s3558_s25  ;;  %v2028_v14 = vsel %vm317_vm3, %v2022_v2, 0 }
 0x92a   : > { %3489 = vrot.lane.b32.xlu1 %v3478_v45, %s3559_s26  ;;  %3484 = vrot.lane.b32.xlu0 %v3478_v45, %s3560_s27 }
 0x998   : > { %v3480_v46 = vpop.permute.xlu1 %3479  ;;  %v3475_v47 = vpop.permute.xlu0 %3474 }
 0x999   : > { %v3482_v48 = vunpack.i.h.bf16 %v3480_v46  ;;  %v3481_v49 = vunpack.i.l.bf16 %v3480_v46  ;;  %v3477_v23 = vunpack.i.h.bf16 %v3475_v47  ;;  %v3476_v50 = vunpack.i.l.bf16 %v3475_v47 }
 0x99b   : > { %v1900_v22 = vsel %vm1566_vm10, %v3481_v49, %v3482_v48  ;;  %v1901_v52 = vsel %vm1566_vm10, %v3482_v48, %v3481_v49  ;;  %v1912_v53 = vsel %vm4477_vm0, %v3476_v50, %v3477_v23  ;;  %v1913_v54 = vsel %vm4478_vm15, %v3477_v23, %v3476_v50 }
 0x99c   : > { %v1915_v55 = vsel %vm4009_vm11, %v1912_v53, 0.0  ;;  %v1914_v56 = vsel %vm4014_vm13, %v1913_v54, 0.0  ;;  %v1903_v57 = vsel %vm4002_vm6, %v1900_v22, 0.0  ;;  %v1902_v58 = vsel %vm4018_vm14, %v1901_v52, 0.0  ;;  %v3485_v11 = vpop.permute.xlu0 %3484  ;;  %v3490_v21 = vpop.permute.xlu1 %3489 }
 0x99d   : > { %v1919_v59 = vpack.c.bf16 %v1915_v55, %v1915_v55  ;;  %v1918_v60 = vpack.c.bf16 %v1914_v56, %v1914_v56  ;;  %v1907_v63 = vpack.c.bf16 %v1903_v57, %v1903_v57  ;;  %v1906_v9 = vpack.c.bf16 %v1902_v58, %v1902_v58 }
 0x99e   : > { %v3487_v18 = vunpack.i.h.bf16 %v3485_v11  ;;  %v3486_v19 = vunpack.i.l.bf16 %v3485_v11  ;;  %v3492_v26 = vunpack.i.h.bf16 %v3490_v21  ;;  %v3491_v16 = vunpack.i.l.bf16 %v3490_v21 }
 0x99f   : > { %3170 = vmatprep.subr.msk.bf16.mxu1 %vm317_vm3, %v1919_v59  ;;  %v1924_v61 = vsel %vm317_vm3, %v1918_v60, 0  ;;  %v1974_v12 = vsel %vm317_vm3, %v1906_v9, 0  ;;  %vm4460_vm0 = vcmp.lt.s32.totalorder %v3622_v5, 120  ;;  %vm4459_vm15 = vcmp.lt.s32.totalorder %v3622_v5, 8 }
 0x9a0   : > { %1930 = vmatpush1.bf16.msra.mxu1 %v1924_v61  ;;  %v2081_v20 = vsel %vm1748_vm1, %v3487_v18, %v3486_v19  ;;  %v2080_v27 = vsel %vm1748_vm1, %v3486_v19, %v3487_v18  ;;  %v2145_v29 = vsel %vm4479_vm4, %v3492_v26, %v3491_v16  ;;  %v2144_v37 = vsel %vm4480_vm5, %v3491_v16, %v3492_v26 }
 0x9a1   : > { %3172 = vmatprep.subr.msk.bf16.mxu1 %vm317_vm3, %v1907_v63  ;;  %v2083_v13 = vsel %vm4053_vm2, %v2081_v20, 0.0  ;;  %v2082_v28 = vsel %vm4074_vm8, %v2080_v27, 0.0  ;;  %v2147_v33 = vsel %vm4083_vm12, %v2145_v29, 0.0  ;;  %v2146_v38 = vsel %vm4102_vm9, %v2144_v37, 0.0 }
 0x9a2   : > { %v2087_v6 = vpack.c.bf16 %v2083_v13, %v2083_v13  ;;  %v2086_v32 = vpack.c.bf16 %v2082_v28, %v2082_v28  ;;  %v2151_v36 = vpack.c.bf16 %v2147_v33, %v2147_v33  ;;  %v2150_v39 = vpack.c.bf16 %v2146_v38, %v2146_v38 }
 0x9a3   : > { %3171 = vmatmul.mubr.msk.bf16.vlgmr.msra.gmra.mrb[8].mxu1 %vm313_vm7, %v3169_v10  ;;  %vm4458_vm4 = vcmp.lt.s32.totalorder %v3631_v8, 8  ;;  %vm4457_vm5 = vcmp.lt.s32.totalorder %v3628_v7, 8 }
 0x9a4   : > { %1980 = vmatpush1.bf16.msra.mxu1 %v1974_v12  ;;  %2011 = vmatprep.mubr.bf16.mxu1 %v3551_v0  ;;  %v2092_v35 = vsel %vm317_vm3, %v2086_v32, 0  ;;  %v2156_v41 = vsel %vm317_vm3, %v2150_v39, 0  ;;  %v3184_v32 = vld [vmem:[%s4451_s1 + $0x7c] sm:$0xf] }
 0x9a5   : > { %3175 = vmatprep.subr.msk.bf16.mxu1 %vm317_vm3, %v2023_v15 }
 0x9af   : > { %3173 = vmatmul.mubr.msk.bf16.vlgmr.msra.gmra.mrb[8].mxu1 %vm313_vm7, %v3168_v24 }
 0x9b0   : > { %2034 = vmatpush1.bf16.msra.mxu1 %v2028_v14  ;;  %2065 = vmatprep.mubr.bf16.mxu1 %v3551_v0 }
 0x9b1   : > { %3178 = vmatprep.subr.msk.bf16.mxu1 %vm317_vm3, %v2087_v6 }
 0x9bb   : > { %3176 = vmatmul.mubr.msk.bf16.vlgmr.msra.gmra.mrb[8].mxu1 %vm313_vm7, %v3174_v34 }
 0x9bc   : > { %2098 = vmatpush1.bf16.msra.mxu1 %v2092_v35  ;;  %2129 = vmatprep.mubr.bf16.mxu1 %v3551_v0 }
 0x9bd   : > { %3181 = vmatprep.subr.msk.bf16.mxu1 %vm317_vm3, %v2151_v36 }
 0x9c7   : > { %3179 = vmatmul.mubr.msk.bf16.vlgmr.msra.gmra.mrb[8].mxu1 %vm313_vm7, %v3177_v40 }
 0x9c8   : > { %2162 = vmatpush1.bf16.msra.mxu1 %v2156_v41  ;;  %2193 = vmatprep.mubr.bf16.mxu1 %v3551_v0  ;;  %v3183_v41 = vld [vmem:[%s4451_s1 + $0x78] sm:$0xf] }
 0x9d3   : > { %3182 = vmatmul.mubr.msk.bf16.vlgmr.msra.gmra.mrb[8].mxu1 %vm313_vm7, %v3180_v42 }
 0x9d4   : > { %2621 = vmatprep.mubr.bf16.mxu1 %v3551_v0 }
 0xaa6   : > { %v2195_v45 = vpop.f32.mrb[8].mxu1 }
 0xaa7   : > { %v2204_v46 = vmax.f32 %v2195_v45, 0.0  ;;  %v2197_v47 = vpop.f32.mrb[9].mxu1 }
 0xaa8   : > { %v2205_v48 = vmax.f32 %v2197_v47, 0.0  ;;  %v2199_v49 = vpop.f32.mrb[10].mxu1 }
 0xaa9   : > { %v2206_v23 = vmul.f32 2.0, %v2204_v46  ;;  %v2200_v50 = vpop.f32.mrb[11].mxu1 }
 0xaaa   : > { %v2207_v22 = vmul.f32 2.0, %v2205_v48 }
 0xaab   : > { %2208 = vrot.lane.b32.xlu0 %v2206_v23, %s3563_s5 }
 0xaac   : > { %2210 = vrot.lane.b32.xlu1 %v2207_v22, %s3563_s5 }
 0xaaf   : > { %2215 = vrot.lane.b32.xlu0 %v2206_v23, %s3564_s6 }
 0xab0   : > { %2217 = vrot.lane.b32.xlu1 %v2207_v22, %s3564_s6 }
 0xb1d   : > { %v2209_v52 = vpop.permute.xlu0 %2208 }
 0xb1e   : > { %v2211_v53 = vpop.permute.xlu1 %2210 }
 0xb1f   : > { %v2213_v56 = vsel %vm4460_vm0, %v2209_v52, %v2211_v53  ;;  %v2214_v57 = vsel %vm4460_vm0, %v2211_v53, %v2209_v52  ;;  %v3189_v53 = vld [vmem:[%s4451_s1 + $0x80] sm:$0xf]  ;;  %vm285_vm0 = vcmp.lt.s32.totalorder %v3628_v7, 4 }
 0xb21   : > { %v2216_v54 = vpop.permute.xlu0 %2215 }
 0xb22   : > { %v2218_v55 = vpop.permute.xlu1 %2217 }
 0xb23   : > { %v2220_v58 = vsel %vm4459_vm15, %v2216_v54, %v2218_v55  ;;  %v2221_v59 = vsel %vm4459_vm15, %v2218_v55, %v2216_v54  ;;  %vm284_vm15 = vcmp.lt.s32.totalorder %v3631_v8, 4 }
 0xb24   : > { %v2222_v60 = vsel %vm4458_vm4, %v2213_v56, %v2221_v59  ;;  %v2223_v61 = vsel %vm4457_vm5, %v2214_v57, %v2220_v58  ;;  %vm4481_vm5 = vcmp.lt.s32.totalorder %v3622_v5, 16  ;;  %v3192_v59 = vld [vmem:[%s4451_s1 + $0x84] sm:$0xf] }
 0xb25   : > { %v4227_v63 = vadd.f32 %v2222_v60, %v4124_v43  ;;  %v4230_v9 = vadd.f32 %v2223_v61, %v4127_v44  ;;  %vm4482_vm4 = vmmov %vm4481_vm5  ;;  %v3195_v61 = vld [vmem:[%s4451_s1 + $0x88] sm:$0xf] }
 0xb27   : > { %v3498_v10 = vpack.i.bf16 %v4230_v9, %v4227_v63  ;;  %v2353_v35 = vpack.c.bf16 %v4230_v9, %v4230_v9  ;;  %v2352_v39 = vpack.c.bf16 %v4227_v63, %v4227_v63 }
 0xb29   : > { %3499 = vrot.lane.b32.xlu1 %v3498_v10, %s3557_s20  ;;  %3494 = vrot.lane.b32.xlu0 %v3498_v10, %s3558_s25  ;;  %v2358_v45 = vsel %vm317_vm3, %v2352_v39, 0 }
 0xb2d   : > { %3509 = vrot.lane.b32.xlu1 %v3498_v10, %s3559_s26  ;;  %3504 = vrot.lane.b32.xlu0 %v3498_v10, %s3560_s27 }
 0xb9b   : > { %v3500_v11 = vpop.permute.xlu1 %3499  ;;  %v3495_v12 = vpop.permute.xlu0 %3494 }
 0xb9c   : > { %v3502_v15 = vunpack.i.h.bf16 %v3500_v11  ;;  %v3501_v18 = vunpack.i.l.bf16 %v3500_v11  ;;  %v3497_v43 = vunpack.i.h.bf16 %v3495_v12  ;;  %v3496_v19 = vunpack.i.l.bf16 %v3495_v12 }
 0xb9e   : > { %v2230_v44 = vsel %vm1566_vm10, %v3501_v18, %v3502_v15  ;;  %v2231_v20 = vsel %vm1566_vm10, %v3502_v15, %v3501_v18  ;;  %v2242_v2 = vsel %vm4481_vm5, %v3496_v19, %v3497_v43  ;;  %v2243_v13 = vsel %vm4482_vm4, %v3497_v43, %v3496_v19 }
 0xb9f   : > { %v2245_v24 = vsel %vm4009_vm11, %v2242_v2, 0.0  ;;  %v2244_v21 = vsel %vm4014_vm13, %v2243_v13, 0.0  ;;  %v2233_v14 = vsel %vm4002_vm6, %v2230_v44, 0.0  ;;  %v2232_v6 = vsel %vm4018_vm14, %v2231_v20, 0.0  ;;  %v3505_v33 = vpop.permute.xlu0 %3504  ;;  %v3510_v42 = vpop.permute.xlu1 %3509 }
 0xba0   : > { %v2249_v26 = vpack.c.bf16 %v2245_v24, %v2245_v24  ;;  %v2248_v16 = vpack.c.bf16 %v2244_v21, %v2244_v21  ;;  %v2237_v28 = vpack.c.bf16 %v2233_v14, %v2233_v14  ;;  %v2236_v29 = vpack.c.bf16 %v2232_v6, %v2232_v6 }
 0xba1   : > { %v3507_v36 = vunpack.i.h.bf16 %v3505_v33  ;;  %v3506_v37 = vunpack.i.l.bf16 %v3505_v33  ;;  %v3512_v47 = vunpack.i.h.bf16 %v3510_v42  ;;  %v3511_v48 = vunpack.i.l.bf16 %v3510_v42 }
 0xba2   : > { %3185 = vmatprep.subr.msk.bf16.mxu0 %vm317_vm3, %v2249_v26  ;;  %v2254_v27 = vsel %vm317_vm3, %v2248_v16, 0  ;;  %v2304_v34 = vsel %vm317_vm3, %v2236_v29, 0  ;;  %vm4483_vm4 = vcmp.lt.s32.totalorder %v3622_v5, 96 }
 0xba3   : > { %2260 = vmatpush1.bf16.msra.mxu0 %v2254_v27  ;;  %v2411_v38 = vsel %vm1748_vm1, %v3507_v36, %v3506_v37  ;;  %v2410_v49 = vsel %vm1748_vm1, %v3506_v37, %v3507_v36  ;;  %v2475_v50 = vsel %vm4483_vm4, %v3512_v47, %v3511_v48  ;;  %vm4484_vm5 = vmmov %vm4483_vm4  ;;  %vm2542_vm4 = vcmp.lt.s32.totalorder %v3622_v5, 116 }
 0xba4   : > { %3187 = vmatprep.subr.msk.bf16.mxu0 %vm317_vm3, %v2237_v28  ;;  %v2413_v40 = vsel %vm4053_vm2, %v2411_v38, 0.0  ;;  %v2412_v23 = vsel %vm4074_vm8, %v2410_v49, 0.0  ;;  %v2477_v52 = vsel %vm4083_vm12, %v2475_v50, 0.0  ;;  %v2474_v56 = vsel %vm4484_vm5, %v3511_v48, %v3512_v47 }
 0xba5   : > { %v2417_v46 = vpack.c.bf16 %v2413_v40, %v2413_v40  ;;  %v2416_v22 = vpack.c.bf16 %v2412_v23, %v2412_v23  ;;  %v2481_v55 = vpack.c.bf16 %v2477_v52, %v2477_v52  ;;  %v2476_v57 = vsel %vm4102_vm9, %v2474_v56, 0.0  ;;  %v3198_v56 = vld [vmem:[%s4451_s1 + $0x8c] sm:$0xf] }
 0xba6   : > { %3186 = vmatmul.mubr.msk.bf16.vlgmr.msra.gmra.mrb[12].mxu0 %vm313_vm7, %v3184_v32  ;;  %v2480_v58 = vpack.c.bf16 %v2476_v57, %v2476_v57  ;;  %vm2549_vm5 = vcmp.lt.s32.totalorder %v3622_v5, 4 }
 0xba7   : > { %2310 = vmatpush1.bf16.msra.mxu0 %v2304_v34  ;;  %2341 = vmatprep.mubr.bf16.mxu0 %v3551_v0  ;;  %v2422_v54 = vsel %vm317_vm3, %v2416_v22, 0 }
 0xba8   : > { %3190 = vmatprep.subr.msk.bf16.mxu0 %vm317_vm3, %v2353_v35  ;;  %v2486_v60 = vsel %vm317_vm3, %v2480_v58, 0 }
 0xbb2   : > { %3188 = vmatmul.mubr.msk.bf16.vlgmr.msra.gmra.mrb[12].mxu0 %vm313_vm7, %v3183_v41 }
 0xbb3   : > { %2364 = vmatpush1.bf16.msra.mxu0 %v2358_v45  ;;  %2395 = vmatprep.mubr.bf16.mxu0 %v3551_v0 }
 0xbb4   : > { %3193 = vmatprep.subr.msk.bf16.mxu0 %vm317_vm3, %v2417_v46 }
 0xbbe   : > { %3191 = vmatmul.mubr.msk.bf16.vlgmr.msra.gmra.mrb[12].mxu0 %vm313_vm7, %v3189_v53 }
 0xbbf   : > { %2428 = vmatpush1.bf16.msra.mxu0 %v2422_v54  ;;  %2459 = vmatprep.mubr.bf16.mxu0 %v3551_v0 }
 0xbc0   : > { %3196 = vmatprep.subr.msk.bf16.mxu0 %vm317_vm3, %v2481_v55 }
 0xbca   : > { %3194 = vmatmul.mubr.msk.bf16.vlgmr.msra.gmra.mrb[12].mxu0 %vm313_vm7, %v3192_v59 }
 0xbcb   : > { %2492 = vmatpush1.bf16.msra.mxu0 %v2486_v60  ;;  %2523 = vmatprep.mubr.bf16.mxu0 %v3551_v0 }
 0xbd6   : > { %3197 = vmatmul.mubr.msk.bf16.vlgmr.msra.gmra.mrb[12].mxu0 %vm313_vm7, %v3195_v61 }
 0xca9   : > { %v2525_v10 = vpop.f32.mrb[12].mxu0 }
 0xcaa   : > { %v2534_v11 = vmax.f32 %v2525_v10, 0.0  ;;  %v2527_v12 = vpop.f32.mrb[13].mxu0 }
 0xcab   : > { %v2535_v15 = vmax.f32 %v2527_v12, 0.0  ;;  %v2529_v18 = vpop.f32.mrb[14].mxu0 }
 0xcac   : > { %v2536_v43 = vmul.f32 2.0, %v2534_v11  ;;  %v2530_v19 = vpop.f32.mrb[15].mxu0  ;;  %v3204_v18 = vld [vmem:[%s4451_s1 + $0x94] sm:$0xf] }
 0xcad   : > { %v2537_v44 = vmul.f32 2.0, %v2535_v15 }
 0xcae   : > { %2538 = vrot.lane.b32.xlu0 %v2536_v43, %s3565_s13 }
 0xcaf   : > { %2540 = vrot.lane.b32.xlu1 %v2537_v44, %s3565_s13 }
 0xcb2   : > { %2545 = vrot.lane.b32.xlu0 %v2536_v43, %s3566_s14 }
 0xcb3   : > { %2547 = vrot.lane.b32.xlu1 %v2537_v44, %s3566_s14 }
 0xd20   : > { %v2539_v20 = vpop.permute.xlu0 %2538 }
 0xd21   : > { %v2541_v2 = vpop.permute.xlu1 %2540 }
 0xd22   : > { %v2543_v21 = vsel %vm2542_vm4, %v2539_v20, %v2541_v2  ;;  %v2544_v14 = vsel %vm2542_vm4, %v2541_v2, %v2539_v20  ;;  %v3207_v20 = vld [vmem:[%s4451_s1 + $0x98] sm:$0xf]  ;;  %vm4494_vm4 = vcmp.lt.s32.totalorder %v3628_v7, 8 }
 0xd24   : > { %v2546_v13 = vpop.permute.xlu0 %2545 }
 0xd25   : > { %v2548_v24 = vpop.permute.xlu1 %2547 }
 0xd26   : > { %v2550_v6 = vsel %vm2549_vm5, %v2546_v13, %v2548_v24  ;;  %v2551_v26 = vsel %vm2549_vm5, %v2548_v24, %v2546_v13  ;;  %v3210_v13 = vld [vmem:[%s4451_s1 + $0x9c] sm:$0xf]  ;;  %vm2990_vm5 = vcmask 0  }
 0xd27   : > { %v2552_v16 = vsel %vm284_vm15, %v2543_v21, %v2551_v26  ;;  %v2553_v27 = vsel %vm285_vm0, %v2544_v14, %v2550_v6  ;;  %vm4485_vm0 = vcmp.lt.s32.totalorder %v3622_v5, 16 }
 0xd28   : > { %v4313_v28 = vadd.f32 %v2552_v16, %v4227_v63  ;;  %v4316_v29 = vadd.f32 %v2553_v27, %v4230_v9  ;;  %vm4486_vm15 = vmmov %vm4485_vm0 }
 0xd2a   : > { %v3518_v32 = vpack.i.bf16 %v4316_v29, %v4313_v28  ;;  %v2683_v31 = vpack.c.bf16 %v4316_v29, %v4316_v29  ;;  %v2682_v54 = vpack.c.bf16 %v4313_v28, %v4313_v28 }
 0xd2c   : > { %3519 = vrot.lane.b32.xlu1 %v3518_v32, %s3557_s20  ;;  %3514 = vrot.lane.b32.xlu0 %v3518_v32, %s3558_s25  ;;  %v2688_v58 = vsel %vm317_vm3, %v2682_v54, 0 }
 0xd30   : > { %3529 = vrot.lane.b32.xlu1 %v3518_v32, %s3559_s26  ;;  %3524 = vrot.lane.b32.xlu0 %v3518_v32, %s3560_s27 }
 0xd9e   : > { %v3520_v33 = vpop.permute.xlu1 %3519  ;;  %v3515_v34 = vpop.permute.xlu0 %3514 }
 0xd9f   : > { %v3522_v35 = vunpack.i.h.bf16 %v3520_v33  ;;  %v3521_v36 = vunpack.i.l.bf16 %v3520_v33  ;;  %v3517_v63 = vunpack.i.h.bf16 %v3515_v34  ;;  %v3516_v37 = vunpack.i.l.bf16 %v3515_v34  ;;  %v2886_v34 = vld [vmem:[%s215_s21] sm:$0x3] }
 0xda1   : > { %v2560_v9 = vsel %vm1566_vm10, %v3521_v36, %v3522_v35  ;;  %v2561_v38 = vsel %vm1566_vm10, %v3522_v35, %v3521_v36  ;;  %v2572_v39 = vsel %vm4485_vm0, %v3516_v37, %v3517_v63  ;;  %v2573_v40 = vsel %vm4486_vm15, %v3517_v63, %v3516_v37 }
 0xda2   : > { %v2575_v41 = vsel %vm4009_vm11, %v2572_v39, 0.0  ;;  %v2574_v42 = vsel %vm4014_vm13, %v2573_v40, 0.0  ;;  %v2563_v45 = vsel %vm4002_vm6, %v2560_v9, 0.0  ;;  %v2562_v46 = vsel %vm4018_vm14, %v2561_v38, 0.0  ;;  %v3525_v25 = vpop.permute.xlu0 %3524  ;;  %v3530_v57 = vpop.permute.xlu1 %3529 }
 0xda3   : > { %v2579_v47 = vpack.c.bf16 %v2575_v41, %v2575_v41  ;;  %v2578_v48 = vpack.c.bf16 %v2574_v42, %v2574_v42  ;;  %v2567_v23 = vpack.c.bf16 %v2563_v45, %v2563_v45  ;;  %v2566_v50 = vpack.c.bf16 %v2562_v46, %v2562_v46 }
 0xda4   : > { %v3527_v22 = vunpack.i.h.bf16 %v3525_v25  ;;  %v3526_v52 = vunpack.i.l.bf16 %v3525_v25  ;;  %v3532_v60 = vunpack.i.h.bf16 %v3530_v57  ;;  %v3531_v61 = vunpack.i.l.bf16 %v3530_v57 }
 0xda5   : > { %3200 = vmatprep.subr.msk.bf16.mxu1 %vm317_vm3, %v2579_v47  ;;  %v2584_v49 = vsel %vm317_vm3, %v2578_v48, 0  ;;  %v2634_v30 = vsel %vm317_vm3, %v2566_v50, 0  ;;  %vm4487_vm6 = vcmp.lt.s32.totalorder %v3622_v5, 96  ;;  %v3567_v63 = vmov 0.0  }
 0xda6   : > { %2590 = vmatpush1.bf16.msra.mxu1 %v2584_v49  ;;  %v2741_v53 = vsel %vm1748_vm1, %v3527_v22, %v3526_v52  ;;  %v2740_v10 = vsel %vm1748_vm1, %v3526_v52, %v3527_v22  ;;  %v2805_v11 = vsel %vm4487_vm6, %v3532_v60, %v3531_v61  ;;  %vm4488_vm10 = vmmov %vm4487_vm6  ;;  %vm4489_vm14 = vcmp.lt.s32.totalorder %v3622_v5, 120 }
 0xda7   : > { %3202 = vmatprep.subr.msk.bf16.mxu1 %vm317_vm3, %v2567_v23  ;;  %v2743_v55 = vsel %vm4053_vm2, %v2741_v53, 0.0  ;;  %v2742_v51 = vsel %vm4074_vm8, %v2740_v10, 0.0  ;;  %v2807_v15 = vsel %vm4083_vm12, %v2805_v11, 0.0  ;;  %v2804_v62 = vsel %vm4488_vm10, %v3531_v61, %v3532_v60  ;;  %vm4490_vm1 = vmmov %vm4489_vm14 }
 0xda8   : > { %v2747_v59 = vpack.c.bf16 %v2743_v55, %v2743_v55  ;;  %v2746_v12 = vpack.c.bf16 %v2742_v51, %v2742_v51  ;;  %v2811_v19 = vpack.c.bf16 %v2807_v15, %v2807_v15  ;;  %v2806_v3 = vsel %vm4102_vm9, %v2804_v62, 0.0 }
 0xda9   : > { %3201 = vmatmul.mubr.msk.bf16.vlgmr.msra.gmra.mrb[12].mxu1 %vm313_vm7, %v3199_v17  ;;  %v2810_v44 = vpack.c.bf16 %v2806_v3, %v2806_v3  ;;  %vm4491_vm2 = vcmp.lt.s32.totalorder %v3622_v5, 8  ;;  %vm4493_vm9 = vcmp.lt.s32.totalorder %v3631_v8, 8 }
 0xdaa   : > { %2640 = vmatpush1.bf16.msra.mxu1 %v2634_v30  ;;  %2671 = vmatprep.mubr.bf16.mxu1 %v3551_v0  ;;  %v2752_v43 = vsel %vm317_vm3, %v2746_v12, 0  ;;  %vm4492_vm8 = vmmov %vm4491_vm2 }
 0xdab   : > { %3205 = vmatprep.subr.msk.bf16.mxu1 %vm317_vm3, %v2683_v31  ;;  %v2816_v2 = vsel %vm317_vm3, %v2810_v44, 0 }
 0xdb5   : > { %3203 = vmatmul.mubr.msk.bf16.vlgmr.msra.gmra.mrb[12].mxu1 %vm313_vm7, %v3198_v56 }
 0xdb6   : > { %2694 = vmatpush1.bf16.msra.mxu1 %v2688_v58  ;;  %2725 = vmatprep.mubr.bf16.mxu1 %v3551_v0 }
 0xdb7   : > { %3208 = vmatprep.subr.msk.bf16.mxu1 %vm317_vm3, %v2747_v59 }
 0xdc1   : > { %3206 = vmatmul.mubr.msk.bf16.vlgmr.msra.gmra.mrb[12].mxu1 %vm313_vm7, %v3204_v18 }
 0xdc2   : > { %2758 = vmatpush1.bf16.msra.mxu1 %v2752_v43  ;;  %2789 = vmatprep.mubr.bf16.mxu1 %v3551_v0 }
 0xdc3   : > { %3211 = vmatprep.subr.msk.bf16.mxu1 %vm317_vm3, %v2811_v19 }
 0xdcd   : > { %3209 = vmatmul.mubr.msk.bf16.vlgmr.msra.gmra.mrb[12].mxu1 %vm313_vm7, %v3207_v20 }
 0xdce   : > { %2822 = vmatpush1.bf16.msra.mxu1 %v2816_v2  ;;  %2853 = vmatprep.mubr.bf16.mxu1 %v3551_v0  ;;  %v2888_v0 = vshrl.u32 %v225_v4, 7 }
 0xdd0   : > { %v2934_v32 = vsub.s32 0, %v2888_v0  ;;  %v2938_v33 = vsub.s32 1, %v2888_v0  ;;  %vm2928_vm3 = vcmp.ge.s32.totalorder %v2888_v0, 1 }
 0xdd2   : > { %v2935_v35 = vrot.slane %v2886_v34, %v2934_v32  ;;  %v2939_v36 = vrot.slane %v2886_v34, %v2938_v33 }
 0xdd4   : > { %vm2940_vm12 = vcmp.eq.s32.totalorder %v2888_v0, %v2935_v35  ;;  %vm2941_vm13 = vcmp.eq.s32.totalorder %v2888_v0, %v2939_v36 }
 0xdd5   : > { %v3214_v4 = vsel %vm2940_vm12, 1.0, %v3567_v63  ;;  %v3215_v9 = vsel %vm2941_vm13, 1.0, %v3567_v63 }
 0xdd9   : > { %3212 = vmatmul.mubr.msk.bf16.vlgmr.msra.gmra.mrb[12].mxu1 %vm313_vm7, %v3210_v13  ;;  %vm2889_vm7 = vcmp.lt.s32.totalorder %v2888_v0, 5 }
 0xdda   : > { %vm2929_vm11 = vmand %vm2928_vm3, %vm2889_vm7 }
 0xddb   : > { %v4404_v37 = vsel %vm2929_vm11, 1.0, %v3567_v63 }
 0xddc   : > { %v4407_v38 = vmul.f32 %v3214_v4, %v4404_v37  ;;  %v4410_v39 = vmul.f32 %v3215_v9, %v4404_v37 }
 0xdde   : > { %v2973_v40 = vmul.f32 %v4407_v38, %v4407_v38  ;;  %v2974_v41 = vmul.f32 %v4410_v39, %v4410_v39 }
 0xde0   : > { %v2975_v42 = vadd.f32 %v2974_v41, %v2973_v40 }
 0xeac   : > { %v2855_v1 = vpop.f32.mrb[12].mxu1 }
 0xead   : > { %v2864_v24 = vmax.f32 %v2855_v1, 0.0  ;;  %v2857_v21 = vpop.f32.mrb[13].mxu1 }
 0xeae   : > { %v2865_v14 = vmax.f32 %v2857_v21, 0.0  ;;  %v2859_v6 = vpop.f32.mrb[14].mxu1 }
 0xeaf   : > { %v2866_v26 = vmul.f32 2.0, %v2864_v24  ;;  %v2860_v16 = vpop.f32.mrb[15].mxu1 }
 0xeb0   : > { %v2867_v27 = vmul.f32 2.0, %v2865_v14 }
 0xeb1   : > { %2868 = vrot.lane.b32.xlu0 %v2866_v26, %s3563_s5 }
 0xeb2   : > { %2870 = vrot.lane.b32.xlu1 %v2867_v27, %s3563_s5 }
 0xeb5   : > { %2874 = vrot.lane.b32.xlu0 %v2866_v26, %s3564_s6 }
 0xeb6   : > { %2876 = vrot.lane.b32.xlu1 %v2867_v27, %s3564_s6 }
 0xeda   : > { %2976 = vadd.xlane.f32.xlu1 %v2975_v42 }
 0xf23   : > { %v2869_v45 = vpop.permute.xlu0 %2868 }
 0xf24   : > { %v2871_v46 = vpop.permute.xlu1 %2870 }
 0xf25   : > { %v2872_v49 = vsel %vm4489_vm14, %v2869_v45, %v2871_v46  ;;  %v2873_v23 = vsel %vm4490_vm1, %v2871_v46, %v2869_v45 }
 0xf27   : > { %v2875_v47 = vpop.permute.xlu0 %2874 }
 0xf28   : > { %v2877_v48 = vpop.permute.xlu1 %2876 }
 0xf29   : > { %v2878_v50 = vsel %vm4491_vm2, %v2875_v47, %v2877_v48  ;;  %v2879_v17 = vsel %vm4492_vm8, %v2877_v48, %v2875_v47 }
 0xf2a   : > { %v2880_v25 = vsel %vm4493_vm9, %v2872_v49, %v2879_v17  ;;  %v2881_v30 = vsel %vm4494_vm4, %v2873_v23, %v2878_v50 }
 0xf2b   : > { %v2882_v31 = vadd.f32 %v2880_v25, %v4313_v28  ;;  %v2883_v22 = vadd.f32 %v2881_v30, %v4316_v29 }
 0xf2d   : > { %2884 = vst [vmem:[%s220_s22] sm:$0xff] %v2882_v31  ;;  %2885 = vst [vmem:[%s220_s22 + $0x8] sm:$0xff] %v2883_v22  ;;  %v2890_v5 = vsel %vm2889_vm7, %v2882_v31, -inf  ;;  %v2891_v52 = vsel %vm2889_vm7, %v2883_v22, -inf }
 0xf2e   : > { %v2892_v53 = vrot.slane %v2890_v5, 4  ;;  %v2898_v54 = vrot.slane %v2891_v52, 4 }
 0xf30   : > { %v2893_v55 = vmax.f32 %v2890_v5, %v2892_v53  ;;  %v2899_v56 = vmax.f32 %v2891_v52, %v2898_v54 }
 0xf32   : > { %v2894_v57 = vrot.slane %v2893_v55, 2  ;;  %v2900_v8 = vrot.slane %v2899_v56, 2 }
 0xf34   : > { %v2895_v58 = vmax.f32 %v2893_v55, %v2894_v57  ;;  %v2901_v59 = vmax.f32 %v2899_v56, %v2900_v8 }
 0xf36   : > { %v2896_v7 = vrot.slane %v2895_v58, 1  ;;  %v2902_v60 = vrot.slane %v2901_v59, 1 }
 0xf38   : > { %v2897_v61 = vmax.f32 %v2895_v58, %v2896_v7  ;;  %v2903_v28 = vmax.f32 %v2901_v59, %v2902_v60 }
 0xf3a   : > { %v2904_v10 = vsub.f32 %v2882_v31, %v2897_v61  ;;  %v2905_v29 = vsub.f32 %v2883_v22, %v2903_v28 }
 0xf3c   : > { %v2906_v51 = vmul.f32 1.442695, %v2904_v10  ;;  %v2908_v11 = vmul.f32 1.442695, %v2905_v29 }
 0xf3e   : > { %3533 = vpow2.f32 %v2906_v51 }
 0xf3f   : > { %3535 = vpow2.f32 %v2908_v11 }
 0xf48   : > { %v3534_v12 = vpop.eup %3533 }
 0xf49   : > { %v3536_v15 = vpop.eup %3535  ;;  %v2910_v18 = vsel %vm2889_vm7, %v3534_v12, 0.0 }
 0xf4a   : > { %v2911_v43 = vsel %vm2889_vm7, %v3536_v15, 0.0  ;;  %v2912_v19 = vrot.slane %v2910_v18, 4 }
 0xf4b   : > { %v2918_v62 = vrot.slane %v2911_v43, 4 }
 0xf4c   : > { %v2913_v3 = vadd.f32 %v2912_v19, %v2910_v18 }
 0xf4d   : > { %v2919_v44 = vadd.f32 %v2918_v62, %v2911_v43 }
 0xf4e   : > { %v2914_v20 = vrot.slane %v2913_v3, 2 }
 0xf4f   : > { %v2920_v2 = vrot.slane %v2919_v44, 2 }
 0xf50   : > { %v2915_v13 = vadd.f32 %v2914_v20, %v2913_v3 }
 0xf51   : > { %v2921_v1 = vadd.f32 %v2920_v2, %v2919_v44 }
 0xf52   : > { %v2916_v24 = vrot.slane %v2915_v13, 1 }
 0xf53   : > { %v2922_v21 = vrot.slane %v2921_v1, 1 }
 0xf54   : > { %v2917_v14 = vadd.f32 %v2916_v24, %v2915_v13 }
 0xf55   : > { %v2923_v6 = vadd.f32 %v2922_v21, %v2921_v1 }
 0xf56   : > { %3537 = vrcp.f32 %v2917_v14 }
 0xf57   : > { %3539 = vrcp.f32 %v2923_v6 }
 0xf60   : > { %v3538_v26 = vpop.eup %3537 }
 0xf61   : > { %v3540_v16 = vpop.eup %3539  ;;  %v2926_v27 = vmul.f32 %v3538_v26, %v2910_v18 }
 0xf62   : > { %v2927_v32 = vmul.f32 %v3540_v16, %v2911_v43 }
 0xf63   : > { %v2948_v0 = vmul.f32 %v4404_v37, %v2926_v27 }
 0xf64   : > { %v2949_v33 = vmul.f32 %v4404_v37, %v2927_v32 }
 0xf65   : > { %v2961_v34 = vmul.f32 %v2948_v0, %v2948_v0  ;;  %v2950_v63 = vmul.f32 %v2948_v0, %v4407_v38 }
 0xf66   : > { %v2962_v35 = vmul.f32 %v2949_v33, %v2949_v33  ;;  %v2951_v4 = vmul.f32 %v2949_v33, %v4410_v39 }
 0xf67   : > { %v2977_v40 = vpop.xlane.xlu1 %2976 }
 0xf68   : > { %v2963_v36 = vadd.f32 %v2962_v35, %v2961_v34  ;;  %v2952_v9 = vadd.f32 %v2951_v4, %v2950_v63  ;;  %v2978_v41 = vrot.slane %v2977_v40, 4 }
 0xf6a   : > { %2964 = vadd.xlane.f32.xlu0 %v2963_v36  ;;  %v2979_v42 = vadd.f32 %v2978_v41, %v2977_v40 }
 0xf6c   : > { %v2980_v45 = vrot.slane %v2979_v42, 2 }
 0xf6e   : > { %2953 = vadd.xlane.f32.xlu0 %v2952_v9  ;;  %v2981_v47 = vadd.f32 %v2980_v45, %v2979_v42 }
 0xf70   : > { %v2982_v37 = vrot.slane %v2981_v47, 1 }
 0xf72   : > { %v2983_v30 = vadd.f32 %v2982_v37, %v2981_v47 }
 0xf74   : > { %v2984_v5 = vadd.f32 0.001, %v2983_v30 }
 0xff7   : > { %v2965_v46 = vpop.xlane.xlu0 %2964 }
 0xff8   : > { %v2966_v48 = vrot.slane %v2965_v46, 4 }
 0xffa   : > { %v2967_v49 = vadd.f32 %v2966_v48, %v2965_v46 }
 0xffb   : > { %v2954_v23 = vpop.xlane.xlu0 %2953 }
 0xffc   : > { %v2968_v50 = vrot.slane %v2967_v49, 2  ;;  %v2955_v17 = vrot.slane %v2954_v23, 4 }
 0xffe   : > { %v2969_v25 = vadd.f32 %v2968_v50, %v2967_v49  ;;  %v2956_v38 = vadd.f32 %v2955_v17, %v2954_v23 }
0x1000   : > { %v2970_v39 = vrot.slane %v2969_v25, 1  ;;  %v2957_v31 = vrot.slane %v2956_v38, 2 }
0x1002   : > { %v2971_v22 = vadd.f32 %v2970_v39, %v2969_v25  ;;  %v2958_v53 = vadd.f32 %v2957_v31, %v2956_v38 }
0x1004   : > { %v2972_v52 = vadd.f32 0.001, %v2971_v22  ;;  %v2959_v55 = vrot.slane %v2958_v53, 1 }
0x1006   : > { %v2986_v54 = vadd.f32 %v2984_v5, %v2972_v52  ;;  %v2960_v56 = vadd.f32 %v2959_v55, %v2958_v53 }
0x1008   : > { %3541 = vrcp.f32 %v2986_v54  ;;  %v2985_v57 = vmul.f32 2.0, %v2960_v56 }
0x1012   : > { %v3542_v8 = vpop.eup %3541 }
0x1013   : > { %v2988_v58 = vmul.f32 %v3542_v8, %v2985_v57 }
0x1015   : > { %v2989_v59 = vsub.f32 1.0, %v2988_v58 }
0x1017   : > { %2991 = vst.msk [vmem:[%s223_s24] sm:$0x1] %vm2990_vm5, %v2989_v59 }
0x1018 PF: > { %s15_s15 = sadd.s32 1, %s3549_s15  }
0x1019   : > { %p12_p4 = scmp.ge.s32.totalorder %s15_s15, 4  }
0x101b   :  { %14 = sbr.rel (!%p12_p4) target bundleno = 1 (0x1), region = 116 }

</bundles_post_ra>
